<compile_context>
chip_gen: v6e
topology: v6e:2x2x1
jax: 0.10.0
libtpu: 0.0.40
codegen_flags: <defaults>
</compile_context>

<pallas_src>
import functools

import jax
import jax.numpy as jnp
from jax.experimental import pallas as pl
from jax.experimental.pallas import tpu as pltpu

TM_MAX = 512   # im2col rows per block (M axis)
TK_MAX = 512   # reduction chunk sliced from the resident full-K weight panel
TN_MAX = 256   # output-channel tile


def _round_up(x, m):
    return ((x + m - 1) // m) * m


def _choose_tm(M):
    """Row tile: multiple of 16, divides the 16-rounded M when possible, and
    yields >=2 M blocks when M is large enough (v7x megacore)."""
    Mp = _round_up(M, 16)
    if Mp <= TM_MAX:
        if Mp >= 256 and Mp % 32 == 0:
            return Mp // 2          # 2 parallel M blocks for the 2 v7x TCs
        return Mp                   # single block (tiny tail layers)
    for tm in range(TM_MAX, 127, -16):
        if Mp % tm == 0:
            return tm               # no M padding pass needed
    return TM_MAX                   # fall back to padding M


def _choose_tn(N):
    for cand in (TN_MAX, 128):
        if N % cand == 0:
            return cand
    return N            # N < 128 (e.g. 16/32/64): single full-N block


def _choose_tk(K):
    for cand in (TK_MAX, 256, 128):
        if K % cand == 0:
            return cand
    return K            # full-K chunk (K = 16*Cin is always a multiple of 16)


# ----------------------------------------------------------------------------
# Pallas kernel: weight-stationary bf16 matmul (f32 acc) + shift + LeakyReLU
# ----------------------------------------------------------------------------
def _fused_matmul_kernel(x_ref, w_ref, shift_ref, o_ref, acc_ref, *,
                         tk, neg_slope):
    k = pl.program_id(2)

    @pl.when(k == 0)
    def _():
        acc_ref[...] = jnp.zeros_like(acc_ref)

    # Slice the k-th K-chunk out of the resident full-K weight panel.
    k_off = pl.multiple_of(k * tk, tk)
    acc_ref[...] += jnp.dot(x_ref[...], w_ref[pl.ds(k_off, tk), :],
                            preferred_element_type=jnp.float32)

    @pl.when(k == pl.num_programs(2) - 1)
    def _():
        y = acc_ref[...] + shift_ref[...]
        if neg_slope is not None:
            y = jnp.where(y >= 0.0, y, neg_slope * y)
        o_ref[...] = y.astype(o_ref.dtype)


def fused_matmul(x, w, shift, neg_slope, out_dtype):
    """out = leaky_relu(x @ w + shift); bf16 operands, f32 accumulation."""
    M, K = x.shape
    K2, N = w.shape
    assert K == K2 and shift.shape == (1, N)

    tm, tn, tk = _choose_tm(M), _choose_tn(N), _choose_tk(K)

    # Only the tiny tail layers (M not a multiple of 16) ever hit this pad;
    # the dominant layers use a tm that divides M exactly.
    Mp = _round_up(M, tm)
    if Mp != M:
        x = jnp.pad(x, ((0, Mp - M), (0, 0)))

    kernel = functools.partial(_fused_matmul_kernel, tk=tk, neg_slope=neg_slope)
    out = pl.pallas_call(
        kernel,
        out_shape=jax.ShapeDtypeStruct((Mp, N), out_dtype),
        grid_spec=pltpu.PrefetchScalarGridSpec(
            num_scalar_prefetch=0,
            # N-tile outermost, M-tile middle, K innermost: the weight / shift
            # block indices depend only on j, so their DMAs are elided across
            # the whole inner (i, k) loop -> weights read from HBM once.
            grid=(N // tn, Mp // tm, K // tk),
            in_specs=[
                pl.BlockSpec((tm, tk), lambda j, i, k: (i, k)),
                pl.BlockSpec((K, tn), lambda j, i, k: (0, j)),   # stationary
                pl.BlockSpec((1, tn), lambda j, i, k: (0, j)),   # stationary
            ],
            out_specs=pl.BlockSpec((tm, tn), lambda j, i, k: (i, j)),
            scratch_shapes=[pltpu.VMEM((tm, tn), jnp.float32)],
        ),
        compiler_params=pltpu.CompilerParams(
            dimension_semantics=("parallel", "parallel", "arbitrary")),
    )(x, w, shift)
    if Mp != M:
        out = out[:M]
    return out


# ----------------------------------------------------------------------------
# JAX glue: im2col with K ordering (kh, kw, Cin) -- matches pre-transposed
# weights, so the patches tensor never needs a materialized transpose.
# ----------------------------------------------------------------------------
def _im2col(x_nhwc, kh, kw, stride, pad):
    B, H, W, C = x_nhwc.shape
    xp = jnp.pad(x_nhwc, ((0, 0), (pad, pad), (pad, pad), (0, 0)))
    Hout = (H + 2 * pad - kh) // stride + 1
    Wout = (W + 2 * pad - kw) // stride + 1
    cols = []
    for i in range(kh):
        for j in range(kw):
            patch = jax.lax.slice(
                xp, (0, i, j, 0),
                (B, i + (Hout - 1) * stride + 1, j + (Wout - 1) * stride + 1, C),
                (1, stride, stride, 1))
            cols.append(patch)                       # [B, Hout, Wout, C]
    patches = jnp.stack(cols, axis=3)                # [B, Hout, Wout, kh*kw, C]
    return patches.reshape(B * Hout * Wout, kh * kw * C), Hout, Wout


def conv2d_block(x_nhwc, layer):
    patches, Ho, Wo = _im2col(x_nhwc, layer['kh'], layer['kw'],
                              layer['stride'], layer['pad'])
    y = fused_matmul(patches, layer['wmat'], layer['shift'],
                     layer['lrelu'], layer['out_dtype'])
    B = x_nhwc.shape[0]
    y = y.reshape(B, Ho, Wo, layer['cout_padded'])
    if layer['cout_padded'] != layer['cout']:
        y = y[..., :layer['cout']]                   # drop lane-padding (tiny)
    return y


# ----------------------------------------------------------------------------
# The model
# ----------------------------------------------------------------------------
class PatchDiscriminatorPallas:
    EPS = 1e-5

    def __init__(self, age_group, conv_dim=64, repeat_num=3,
                 key=jax.random.PRNGKey(0)):
        self.age_group = age_group
        self.conv_dim = conv_dim

        specs = []
        # conv1: 3 -> conv_dim, stride 2, LeakyReLU applied in forward
        specs.append(dict(cin=3, cout=conv_dim, stride=2, bn=False, lrelu=True))
        nf_mult = 1
        for n in range(1, repeat_num):
            nf_mult_prev = nf_mult
            nf_mult = min(2 ** n, 8)
            cin = conv_dim * nf_mult_prev + (age_group if n == 1 else 0)
            specs.append(dict(cin=cin, cout=conv_dim * nf_mult, stride=2,
                              bn=True, lrelu=True))
        nf_mult_prev = nf_mult
        nf_mult = min(2 ** repeat_num, 8)
        specs.append(dict(cin=conv_dim * nf_mult_prev, cout=conv_dim * nf_mult,
                          stride=1, bn=True, lrelu=True))
        specs.append(dict(cin=conv_dim * nf_mult, cout=1, stride=1,
                          bn=False, lrelu=False))

        # The concat layer's Cin is padded to a multiple of 16 so K = 16*Cin
        # stays 256-aligned; padded channels are zero in both the activation
        # (one-hot tail) and the corresponding weight rows.
        concat_cin = specs[1]['cin']
        self.concat_cin_padded = _round_up(concat_cin, 16)
        self.cond_channels = self.concat_cin_padded - conv_dim

        # TODO(synk): get_norm_layer('bn', conv) is assumed to be
        # Sequential(conv, BatchNorm2d) evaluated in inference mode with default
        # running stats (mean=0, var=1, gamma=1, beta=0); train-mode batch
        # statistics are not reproduced.
        self.layers = []
        n_layers = len(specs)
        for idx, spec in enumerate(specs):
            key, kw_, kb_ = jax.random.split(key, 3)
            cin, cout = spec['cin'], spec['cout']
            w = 0.02 * jax.random.normal(kw_, (cout, cin, 4, 4), jnp.float32)
            b = 0.02 * jax.random.normal(kb_, (cout,), jnp.float32)
            if spec['bn']:
                gamma = jnp.ones((cout,), jnp.float32)
                beta = jnp.zeros((cout,), jnp.float32)
                mean = jnp.zeros((cout,), jnp.float32)
                var = jnp.ones((cout,), jnp.float32)
                s = gamma / jnp.sqrt(var + self.EPS)
                scale = s
                shift = (b - mean) * s + beta
            else:
                scale = jnp.ones((cout,), jnp.float32)
                shift = b

            # Zero-pad Cin of the concat layer (matches padded one-hot input).
            cin_pad = self.concat_cin_padded if idx == 1 else cin
            if cin_pad != cin:
                w = jnp.pad(w, ((0, 0), (0, cin_pad - cin), (0, 0), (0, 0)))

            is_last = idx == n_layers - 1
            # Lane-dense head: pad the 1-channel output to 128 lanes so stores
            # are full-width; real channel sliced off in the wrapper.
            cout_pad = _round_up(cout, 128) if is_last else cout

            # Hoisted, run-once weight prep: (O,I,KH,KW) -> (KH*KW*Cin, Cout)
            # matching the im2col K ordering, BN scale folded in, bf16 cast.
            wmat = w.transpose(0, 2, 3, 1).reshape(cout, -1).T
            wmat = wmat * scale[None, :]
            if cout_pad != cout:
                wmat = jnp.pad(wmat, ((0, 0), (0, cout_pad - cout)))
                shift = jnp.pad(shift, ((0, cout_pad - cout),))
            wmat = wmat.astype(jnp.bfloat16)

            self.layers.append(dict(
                wmat=wmat,
                shift=shift.reshape(1, -1).astype(jnp.float32),
                stride=spec['stride'], pad=1, kh=4, kw=4,
                cout=cout, cout_padded=cout_pad,
                lrelu=0.2 if spec['lrelu'] else None,
                out_dtype=jnp.float32 if is_last else jnp.bfloat16,
            ))

    def __call__(self, inputs_nchw, condition):
        # inputs: [B, 3, H, W] (NCHW as in PyTorch); condition: int32 group ids [B]
        x = jnp.transpose(inputs_nchw, (0, 2, 3, 1)).astype(jnp.bfloat16)  # NHWC

        x = conv2d_block(x, self.layers[0])

        # group2feature: one-hot group id broadcast over the spatial map,
        # widened with zero channels so the concat-layer Cin stays 16-aligned.
        onehot = jax.nn.one_hot(condition, self.cond_channels, dtype=x.dtype)
        cond = jnp.broadcast_to(
            onehot[:, None, None, :],
            (x.shape[0], x.shape[1], x.shape[2], self.cond_channels))
        x = jnp.concatenate([x, cond], axis=-1)

        for layer in self.layers[1:]:
            x = conv2d_block(x, layer)

        return jnp.transpose(x, (0, 3, 1, 2))  # NCHW: [B, 1, Hf, Wf]


if __name__ == "__main__":
    key = jax.random.PRNGKey(0)
    kx, kc, kp = jax.random.split(key, 3)

    B, H, W = 2, 32, 32
    age_group = 4
    inputs = jax.random.normal(kx, (B, 3, H, W), jnp.float32)
    condition = jax.random.randint(kc, (B,), 0, age_group)

    model = PatchDiscriminatorPallas(age_group=age_group, conv_dim=16,
                                     repeat_num=3, key=kp)
    out = jax.jit(model.__call__)(inputs, condition)
    out = jax.block_until_ready(out)
    # 32 ->16 (conv1) ->8 ->4 (strided convs) ->3 ->2 (stride-1, k=4, p=1 convs)
    assert out.shape == (B, 1, 2, 2), out.shape
    assert bool(jnp.all(jnp.isfinite(out)))
    print("KERNEL_OK")
</pallas_src>

<mosaic_0001>
module attributes {stable_mosaic.version = 11 : i64} {
  func.func @_fused_matmul_kernel(%arg0: i32, %arg1: i32, %arg2: i32, %arg3: memref<256x48xbf16, #tpu.memory_space<vmem>>, %arg4: memref<48x16xbf16, #tpu.memory_space<vmem>>, %arg5: memref<1x16xf32, #tpu.memory_space<vmem>>, %arg6: memref<256x16xbf16, #tpu.memory_space<vmem>>, %arg7: memref<256x16xf32, #tpu.memory_space<vmem>>) attributes {dimension_semantics = [#tpu.dimension_semantics<parallel>, #tpu.dimension_semantics<parallel>, #tpu.dimension_semantics<arbitrary>], iteration_bounds = array<i64: 1, 2, 1>, scalar_prefetch = 0 : i64, scratch_operands = 1 : i64, tpu.core_type = #tpu.core_type<tc>, window_params = [{transform_indices = @transform_0, window_bounds = array<i64: 256, 48>}, {transform_indices = @transform_1, window_bounds = array<i64: 48, 16>}, {transform_indices = @transform_2, window_bounds = array<i64: 1, 16>}, {transform_indices = @transform_3, window_bounds = array<i64: 256, 16>}]} {
    %c0_i32 = arith.constant 0 : i32
    %0 = arith.cmpi eq, %arg2, %c0_i32 : i32
    %1 = arith.extui %0 : i1 to i32
    %c0_i32_0 = arith.constant 0 : i32
    %2 = arith.cmpi ne, %1, %c0_i32_0 : i32
    scf.if %2 {
      %cst_9 = arith.constant 0.000000e+00 : f32
      %15 = vector.broadcast %cst_9 : f32 to vector<256x16xf32>
      %c0_10 = arith.constant 0 : index
      %c0_11 = arith.constant 0 : index
      %16 = vector.load %arg7[%c0_10, %c0_11] : memref<256x16xf32, #tpu.memory_space<vmem>>, vector<256x16xf32>
      tpu.vector_store %arg7[%c0_10, %c0_11], %15 {strides = array<i32>} : memref<256x16xf32, #tpu.memory_space<vmem>>, vector<256x16xf32>,
    } else {
    }
    %c48_i32 = arith.constant 48 : i32
    %3 = arith.muli %arg2, %c48_i32 : i32
    %4 = tpu.assume_multiple %3, 48 : i32
    %c0 = arith.constant 0 : index
    %c0_1 = arith.constant 0 : index
    %5 = vector.load %arg7[%c0, %c0_1] : memref<256x16xf32, #tpu.memory_space<vmem>>, vector<256x16xf32>
    %c0_2 = arith.constant 0 : index
    %c0_3 = arith.constant 0 : index
    %6 = vector.load %arg3[%c0_2, %c0_3] : memref<256x48xbf16, #tpu.memory_space<vmem>>, vector<256x48xbf16>
    %7 = arith.index_cast %4 : i32 to index
    %c0_4 = arith.constant 0 : index
    %8 = vector.load %arg4[%7, %c0_4] : memref<48x16xbf16, #tpu.memory_space<vmem>>, vector<48x16xbf16>
    %cst = arith.constant dense<0.000000e+00> : vector<256x16xf32>
    %9 = tpu.matmul %6, %8, %cst {dimension_numbers = #tpu.dot_dimension_numbers<[1], [0], [0], [1], [0, 0, 1, 1], [], []>} : vector<256x48xbf16>, vector<48x16xbf16>, vector<256x16xf32> -> vector<256x16xf32>
    %10 = arith.addf %5, %9 : vector<256x16xf32>
    %c0_5 = arith.constant 0 : index
    %c0_6 = arith.constant 0 : index
    %11 = vector.load %arg7[%c0_5, %c0_6] : memref<256x16xf32, #tpu.memory_space<vmem>>, vector<256x16xf32>
    tpu.vector_store %arg7[%c0_5, %c0_6], %10 {strides = array<i32>} : memref<256x16xf32, #tpu.memory_space<vmem>>, vector<256x16xf32>,
    %c0_i32_7 = arith.constant 0 : i32
    %12 = arith.cmpi eq, %arg2, %c0_i32_7 : i32
    %13 = arith.extui %12 : i1 to i32
    %c0_i32_8 = arith.constant 0 : i32
    %14 = arith.cmpi ne, %13, %c0_i32_8 : i32
    scf.if %14 {
      %c0_9 = arith.constant 0 : index
      %c0_10 = arith.constant 0 : index
      %15 = vector.load %arg7[%c0_9, %c0_10] : memref<256x16xf32, #tpu.memory_space<vmem>>, vector<256x16xf32>
      %c0_11 = arith.constant 0 : index
      %c0_12 = arith.constant 0 : index
      %16 = vector.load %arg5[%c0_11, %c0_12] : memref<1x16xf32, #tpu.memory_space<vmem>>, vector<1x16xf32>
      %17 = vector.broadcast %16 : vector<1x16xf32> to vector<256x16xf32>
      %18 = arith.addf %15, %17 : vector<256x16xf32>
      %cst_13 = arith.constant 0.000000e+00 : f32
      %19 = vector.broadcast %cst_13 : f32 to vector<256x16xf32>
      %20 = arith.cmpf oge, %18, %19 : vector<256x16xf32>
      %cst_14 = arith.constant 2.000000e-01 : f32
      %21 = vector.broadcast %cst_14 : f32 to vector<256x16xf32>
      %22 = arith.mulf %21, %18 : vector<256x16xf32>
      %23 = arith.select %20, %18, %22 : vector<256x16xi1>, vector<256x16xf32>
      %24 = arith.truncf %23 : vector<256x16xf32> to vector<256x16xbf16>
      %c0_15 = arith.constant 0 : index
      %c0_16 = arith.constant 0 : index
      %25 = vector.load %arg6[%c0_15, %c0_16] : memref<256x16xbf16, #tpu.memory_space<vmem>>, vector<256x16xbf16>
      tpu.vector_store %arg6[%c0_15, %c0_16], %24 {strides = array<i32>} : memref<256x16xbf16, #tpu.memory_space<vmem>>, vector<256x16xbf16>,
    } else {
    }
    return
  }
  func.func @transform_0(%arg0: i32, %arg1: i32, %arg2: i32) -> (i32, i32) {
    %c0_i32 = arith.constant 0 : i32
    return %arg1, %arg2 : i32, i32
  }
  func.func @transform_1(%arg0: i32, %arg1: i32, %arg2: i32) -> (i32, i32) {
    %c0_i32 = arith.constant 0 : i32
    %c0_i32_0 = arith.constant 0 : i32
    return %c0_i32, %arg0 : i32, i32
  }
  func.func @transform_2(%arg0: i32, %arg1: i32, %arg2: i32) -> (i32, i32) {
    %c0_i32 = arith.constant 0 : i32
    %c0_i32_0 = arith.constant 0 : i32
    return %c0_i32, %arg0 : i32, i32
  }
  func.func @transform_3(%arg0: i32, %arg1: i32, %arg2: i32) -> (i32, i32) {
    %c0_i32 = arith.constant 0 : i32
    return %arg1, %arg0 : i32, i32
  }
}

module attributes {stable_mosaic.version = 11 : i64} {
  func.func @_fused_matmul_kernel(%arg0: i32, %arg1: i32, %arg2: i32, %arg3: memref<128x512xbf16, #tpu.memory_space<vmem>>, %arg4: memref<512x32xbf16, #tpu.memory_space<vmem>>, %arg5: memref<1x32xf32, #tpu.memory_space<vmem>>, %arg6: memref<128x32xbf16, #tpu.memory_space<vmem>>, %arg7: memref<128x32xf32, #tpu.memory_space<vmem>>) attributes {dimension_semantics = [#tpu.dimension_semantics<parallel>, #tpu.dimension_semantics<parallel>, #tpu.dimension_semantics<arbitrary>], iteration_bounds = array<i64: 1, 1, 1>, scalar_prefetch = 0 : i64, scratch_operands = 1 : i64, tpu.core_type = #tpu.core_type<tc>, window_params = [{transform_indices = @transform_0, window_bounds = array<i64: 128, 512>}, {transform_indices = @transform_1, window_bounds = array<i64: 512, 32>}, {transform_indices = @transform_2, window_bounds = array<i64: 1, 32>}, {transform_indices = @transform_3, window_bounds = array<i64: 128, 32>}]} {
    %c0_i32 = arith.constant 0 : i32
    %0 = arith.cmpi eq, %arg2, %c0_i32 : i32
    %1 = arith.extui %0 : i1 to i32
    %c0_i32_0 = arith.constant 0 : i32
    %2 = arith.cmpi ne, %1, %c0_i32_0 : i32
    scf.if %2 {
      %cst_9 = arith.constant 0.000000e+00 : f32
      %15 = vector.broadcast %cst_9 : f32 to vector<128x32xf32>
      %c0_10 = arith.constant 0 : index
      %c0_11 = arith.constant 0 : index
      %16 = vector.load %arg7[%c0_10, %c0_11] : memref<128x32xf32, #tpu.memory_space<vmem>>, vector<128x32xf32>
      tpu.vector_store %arg7[%c0_10, %c0_11], %15 {strides = array<i32>} : memref<128x32xf32, #tpu.memory_space<vmem>>, vector<128x32xf32>,
    } else {
    }
    %c512_i32 = arith.constant 512 : i32
    %3 = arith.muli %arg2, %c512_i32 : i32
    %4 = tpu.assume_multiple %3, 512 : i32
    %c0 = arith.constant 0 : index
    %c0_1 = arith.constant 0 : index
    %5 = vector.load %arg7[%c0, %c0_1] : memref<128x32xf32, #tpu.memory_space<vmem>>, vector<128x32xf32>
    %c0_2 = arith.constant 0 : index
    %c0_3 = arith.constant 0 : index
    %6 = vector.load %arg3[%c0_2, %c0_3] : memref<128x512xbf16, #tpu.memory_space<vmem>>, vector<128x512xbf16>
    %7 = arith.index_cast %4 : i32 to index
    %c0_4 = arith.constant 0 : index
    %8 = vector.load %arg4[%7, %c0_4] : memref<512x32xbf16, #tpu.memory_space<vmem>>, vector<512x32xbf16>
    %cst = arith.constant dense<0.000000e+00> : vector<128x32xf32>
    %9 = tpu.matmul %6, %8, %cst {dimension_numbers = #tpu.dot_dimension_numbers<[1], [0], [0], [1], [0, 0, 1, 1], [], []>} : vector<128x512xbf16>, vector<512x32xbf16>, vector<128x32xf32> -> vector<128x32xf32>
    %10 = arith.addf %5, %9 : vector<128x32xf32>
    %c0_5 = arith.constant 0 : index
    %c0_6 = arith.constant 0 : index
    %11 = vector.load %arg7[%c0_5, %c0_6] : memref<128x32xf32, #tpu.memory_space<vmem>>, vector<128x32xf32>
    tpu.vector_store %arg7[%c0_5, %c0_6], %10 {strides = array<i32>} : memref<128x32xf32, #tpu.memory_space<vmem>>, vector<128x32xf32>,
    %c0_i32_7 = arith.constant 0 : i32
    %12 = arith.cmpi eq, %arg2, %c0_i32_7 : i32
    %13 = arith.extui %12 : i1 to i32
    %c0_i32_8 = arith.constant 0 : i32
    %14 = arith.cmpi ne, %13, %c0_i32_8 : i32
    scf.if %14 {
      %c0_9 = arith.constant 0 : index
      %c0_10 = arith.constant 0 : index
      %15 = vector.load %arg7[%c0_9, %c0_10] : memref<128x32xf32, #tpu.memory_space<vmem>>, vector<128x32xf32>
      %c0_11 = arith.constant 0 : index
      %c0_12 = arith.constant 0 : index
      %16 = vector.load %arg5[%c0_11, %c0_12] : memref<1x32xf32, #tpu.memory_space<vmem>>, vector<1x32xf32>
      %17 = vector.broadcast %16 : vector<1x32xf32> to vector<128x32xf32>
      %18 = arith.addf %15, %17 : vector<128x32xf32>
      %cst_13 = arith.constant 0.000000e+00 : f32
      %19 = vector.broadcast %cst_13 : f32 to vector<128x32xf32>
      %20 = arith.cmpf oge, %18, %19 : vector<128x32xf32>
      %cst_14 = arith.constant 2.000000e-01 : f32
      %21 = vector.broadcast %cst_14 : f32 to vector<128x32xf32>
      %22 = arith.mulf %21, %18 : vector<128x32xf32>
      %23 = arith.select %20, %18, %22 : vector<128x32xi1>, vector<128x32xf32>
      %24 = arith.truncf %23 : vector<128x32xf32> to vector<128x32xbf16>
      %c0_15 = arith.constant 0 : index
      %c0_16 = arith.constant 0 : index
      %25 = vector.load %arg6[%c0_15, %c0_16] : memref<128x32xbf16, #tpu.memory_space<vmem>>, vector<128x32xbf16>
      tpu.vector_store %arg6[%c0_15, %c0_16], %24 {strides = array<i32>} : memref<128x32xbf16, #tpu.memory_space<vmem>>, vector<128x32xbf16>,
    } else {
    }
    return
  }
  func.func @transform_0(%arg0: i32, %arg1: i32, %arg2: i32) -> (i32, i32) {
    %c0_i32 = arith.constant 0 : i32
    return %arg1, %arg2 : i32, i32
  }
  func.func @transform_1(%arg0: i32, %arg1: i32, %arg2: i32) -> (i32, i32) {
    %c0_i32 = arith.constant 0 : i32
    %c0_i32_0 = arith.constant 0 : i32
    return %c0_i32, %arg0 : i32, i32
  }
  func.func @transform_2(%arg0: i32, %arg1: i32, %arg2: i32) -> (i32, i32) {
    %c0_i32 = arith.constant 0 : i32
    %c0_i32_0 = arith.constant 0 : i32
    return %c0_i32, %arg0 : i32, i32
  }
  func.func @transform_3(%arg0: i32, %arg1: i32, %arg2: i32) -> (i32, i32) {
    %c0_i32 = arith.constant 0 : i32
    return %arg1, %arg0 : i32, i32
  }
}

module attributes {stable_mosaic.version = 11 : i64} {
  func.func @_fused_matmul_kernel(%arg0: i32, %arg1: i32, %arg2: i32, %arg3: memref<32x512xbf16, #tpu.memory_space<vmem>>, %arg4: memref<512x64xbf16, #tpu.memory_space<vmem>>, %arg5: memref<1x64xf32, #tpu.memory_space<vmem>>, %arg6: memref<32x64xbf16, #tpu.memory_space<vmem>>, %arg7: memref<32x64xf32, #tpu.memory_space<vmem>>) attributes {dimension_semantics = [#tpu.dimension_semantics<parallel>, #tpu.dimension_semantics<parallel>, #tpu.dimension_semantics<arbitrary>], iteration_bounds = array<i64: 1, 1, 1>, scalar_prefetch = 0 : i64, scratch_operands = 1 : i64, tpu.core_type = #tpu.core_type<tc>, window_params = [{transform_indices = @transform_0, window_bounds = array<i64: 32, 512>}, {transform_indices = @transform_1, window_bounds = array<i64: 512, 64>}, {transform_indices = @transform_2, window_bounds = array<i64: 1, 64>}, {transform_indices = @transform_3, window_bounds = array<i64: 32, 64>}]} {
    %c0_i32 = arith.constant 0 : i32
    %0 = arith.cmpi eq, %arg2, %c0_i32 : i32
    %1 = arith.extui %0 : i1 to i32
    %c0_i32_0 = arith.constant 0 : i32
    %2 = arith.cmpi ne, %1, %c0_i32_0 : i32
    scf.if %2 {
      %cst_9 = arith.constant 0.000000e+00 : f32
      %15 = vector.broadcast %cst_9 : f32 to vector<32x64xf32>
      %c0_10 = arith.constant 0 : index
      %c0_11 = arith.constant 0 : index
      %16 = vector.load %arg7[%c0_10, %c0_11] : memref<32x64xf32, #tpu.memory_space<vmem>>, vector<32x64xf32>
      tpu.vector_store %arg7[%c0_10, %c0_11], %15 {strides = array<i32>} : memref<32x64xf32, #tpu.memory_space<vmem>>, vector<32x64xf32>,
    } else {
    }
    %c512_i32 = arith.constant 512 : i32
    %3 = arith.muli %arg2, %c512_i32 : i32
    %4 = tpu.assume_multiple %3, 512 : i32
    %c0 = arith.constant 0 : index
    %c0_1 = arith.constant 0 : index
    %5 = vector.load %arg7[%c0, %c0_1] : memref<32x64xf32, #tpu.memory_space<vmem>>, vector<32x64xf32>
    %c0_2 = arith.constant 0 : index
    %c0_3 = arith.constant 0 : index
    %6 = vector.load %arg3[%c0_2, %c0_3] : memref<32x512xbf16, #tpu.memory_space<vmem>>, vector<32x512xbf16>
    %7 = arith.index_cast %4 : i32 to index
    %c0_4 = arith.constant 0 : index
    %8 = vector.load %arg4[%7, %c0_4] : memref<512x64xbf16, #tpu.memory_space<vmem>>, vector<512x64xbf16>
    %cst = arith.constant dense<0.000000e+00> : vector<32x64xf32>
    %9 = tpu.matmul %6, %8, %cst {dimension_numbers = #tpu.dot_dimension_numbers<[1], [0], [0], [1], [0, 0, 1, 1], [], []>} : vector<32x512xbf16>, vector<512x64xbf16>, vector<32x64xf32> -> vector<32x64xf32>
    %10 = arith.addf %5, %9 : vector<32x64xf32>
    %c0_5 = arith.constant 0 : index
    %c0_6 = arith.constant 0 : index
    %11 = vector.load %arg7[%c0_5, %c0_6] : memref<32x64xf32, #tpu.memory_space<vmem>>, vector<32x64xf32>
    tpu.vector_store %arg7[%c0_5, %c0_6], %10 {strides = array<i32>} : memref<32x64xf32, #tpu.memory_space<vmem>>, vector<32x64xf32>,
    %c0_i32_7 = arith.constant 0 : i32
    %12 = arith.cmpi eq, %arg2, %c0_i32_7 : i32
    %13 = arith.extui %12 : i1 to i32
    %c0_i32_8 = arith.constant 0 : i32
    %14 = arith.cmpi ne, %13, %c0_i32_8 : i32
    scf.if %14 {
      %c0_9 = arith.constant 0 : index
      %c0_10 = arith.constant 0 : index
      %15 = vector.load %arg7[%c0_9, %c0_10] : memref<32x64xf32, #tpu.memory_space<vmem>>, vector<32x64xf32>
      %c0_11 = arith.constant 0 : index
      %c0_12 = arith.constant 0 : index
      %16 = vector.load %arg5[%c0_11, %c0_12] : memref<1x64xf32, #tpu.memory_space<vmem>>, vector<1x64xf32>
      %17 = vector.broadcast %16 : vector<1x64xf32> to vector<32x64xf32>
      %18 = arith.addf %15, %17 : vector<32x64xf32>
      %cst_13 = arith.constant 0.000000e+00 : f32
      %19 = vector.broadcast %cst_13 : f32 to vector<32x64xf32>
      %20 = arith.cmpf oge, %18, %19 : vector<32x64xf32>
      %cst_14 = arith.constant 2.000000e-01 : f32
      %21 = vector.broadcast %cst_14 : f32 to vector<32x64xf32>
      %22 = arith.mulf %21, %18 : vector<32x64xf32>
      %23 = arith.select %20, %18, %22 : vector<32x64xi1>, vector<32x64xf32>
      %24 = arith.truncf %23 : vector<32x64xf32> to vector<32x64xbf16>
      %c0_15 = arith.constant 0 : index
      %c0_16 = arith.constant 0 : index
      %25 = vector.load %arg6[%c0_15, %c0_16] : memref<32x64xbf16, #tpu.memory_space<vmem>>, vector<32x64xbf16>
      tpu.vector_store %arg6[%c0_15, %c0_16], %24 {strides = array<i32>} : memref<32x64xbf16, #tpu.memory_space<vmem>>, vector<32x64xbf16>,
    } else {
    }
    return
  }
  func.func @transform_0(%arg0: i32, %arg1: i32, %arg2: i32) -> (i32, i32) {
    %c0_i32 = arith.constant 0 : i32
    return %arg1, %arg2 : i32, i32
  }
  func.func @transform_1(%arg0: i32, %arg1: i32, %arg2: i32) -> (i32, i32) {
    %c0_i32 = arith.constant 0 : i32
    %c0_i32_0 = arith.constant 0 : i32
    return %c0_i32, %arg0 : i32, i32
  }
  func.func @transform_2(%arg0: i32, %arg1: i32, %arg2: i32) -> (i32, i32) {
    %c0_i32 = arith.constant 0 : i32
    %c0_i32_0 = arith.constant 0 : i32
    return %c0_i32, %arg0 : i32, i32
  }
  func.func @transform_3(%arg0: i32, %arg1: i32, %arg2: i32) -> (i32, i32) {
    %c0_i32 = arith.constant 0 : i32
    return %arg1, %arg0 : i32, i32
  }
}

module attributes {stable_mosaic.version = 11 : i64} {
  func.func @_fused_matmul_kernel(%arg0: i32, %arg1: i32, %arg2: i32, %arg3: memref<32x512xbf16, #tpu.memory_space<vmem>>, %arg4: memref<1024x128xbf16, #tpu.memory_space<vmem>>, %arg5: memref<1x128xf32, #tpu.memory_space<vmem>>, %arg6: memref<32x128xbf16, #tpu.memory_space<vmem>>, %arg7: memref<32x128xf32, #tpu.memory_space<vmem>>) attributes {dimension_semantics = [#tpu.dimension_semantics<parallel>, #tpu.dimension_semantics<parallel>, #tpu.dimension_semantics<arbitrary>], iteration_bounds = array<i64: 1, 1, 2>, scalar_prefetch = 0 : i64, scratch_operands = 1 : i64, tpu.core_type = #tpu.core_type<tc>, window_params = [{transform_indices = @transform_0, window_bounds = array<i64: 32, 512>}, {transform_indices = @transform_1, window_bounds = array<i64: 1024, 128>}, {transform_indices = @transform_2, window_bounds = array<i64: 1, 128>}, {transform_indices = @transform_3, window_bounds = array<i64: 32, 128>}]} {
    %c0_i32 = arith.constant 0 : i32
    %0 = arith.cmpi eq, %arg2, %c0_i32 : i32
    %1 = arith.extui %0 : i1 to i32
    %c0_i32_0 = arith.constant 0 : i32
    %2 = arith.cmpi ne, %1, %c0_i32_0 : i32
    scf.if %2 {
      %cst_8 = arith.constant 0.000000e+00 : f32
      %15 = vector.broadcast %cst_8 : f32 to vector<32x128xf32>
      %c0_9 = arith.constant 0 : index
      %c0_10 = arith.constant 0 : index
      %16 = vector.load %arg7[%c0_9, %c0_10] : memref<32x128xf32, #tpu.memory_space<vmem>>, vector<32x128xf32>
      tpu.vector_store %arg7[%c0_9, %c0_10], %15 {strides = array<i32>} : memref<32x128xf32, #tpu.memory_space<vmem>>, vector<32x128xf32>,
    } else {
    }
    %c512_i32 = arith.constant 512 : i32
    %3 = arith.muli %arg2, %c512_i32 : i32
    %4 = tpu.assume_multiple %3, 512 : i32
    %c0 = arith.constant 0 : index
    %c0_1 = arith.constant 0 : index
    %5 = vector.load %arg7[%c0, %c0_1] : memref<32x128xf32, #tpu.memory_space<vmem>>, vector<32x128xf32>
    %c0_2 = arith.constant 0 : index
    %c0_3 = arith.constant 0 : index
    %6 = vector.load %arg3[%c0_2, %c0_3] : memref<32x512xbf16, #tpu.memory_space<vmem>>, vector<32x512xbf16>
    %7 = arith.index_cast %4 : i32 to index
    %c0_4 = arith.constant 0 : index
    %8 = vector.load %arg4[%7, %c0_4] : memref<1024x128xbf16, #tpu.memory_space<vmem>>, vector<512x128xbf16>
    %cst = arith.constant dense<0.000000e+00> : vector<32x128xf32>
    %9 = tpu.matmul %6, %8, %cst {dimension_numbers = #tpu.dot_dimension_numbers<[1], [0], [0], [1], [0, 0, 1, 1], [], []>} : vector<32x512xbf16>, vector<512x128xbf16>, vector<32x128xf32> -> vector<32x128xf32>
    %10 = arith.addf %5, %9 : vector<32x128xf32>
    %c0_5 = arith.constant 0 : index
    %c0_6 = arith.constant 0 : index
    %11 = vector.load %arg7[%c0_5, %c0_6] : memref<32x128xf32, #tpu.memory_space<vmem>>, vector<32x128xf32>
    tpu.vector_store %arg7[%c0_5, %c0_6], %10 {strides = array<i32>} : memref<32x128xf32, #tpu.memory_space<vmem>>, vector<32x128xf32>,
    %c1_i32 = arith.constant 1 : i32
    %12 = arith.cmpi eq, %arg2, %c1_i32 : i32
    %13 = arith.extui %12 : i1 to i32
    %c0_i32_7 = arith.constant 0 : i32
    %14 = arith.cmpi ne, %13, %c0_i32_7 : i32
    scf.if %14 {
      %c0_8 = arith.constant 0 : index
      %c0_9 = arith.constant 0 : index
      %15 = vector.load %arg7[%c0_8, %c0_9] : memref<32x128xf32, #tpu.memory_space<vmem>>, vector<32x128xf32>
      %c0_10 = arith.constant 0 : index
      %c0_11 = arith.constant 0 : index
      %16 = vector.load %arg5[%c0_10, %c0_11] : memref<1x128xf32, #tpu.memory_space<vmem>>, vector<1x128xf32>
      %17 = vector.broadcast %16 : vector<1x128xf32> to vector<32x128xf32>
      %18 = arith.addf %15, %17 : vector<32x128xf32>
      %cst_12 = arith.constant 0.000000e+00 : f32
      %19 = vector.broadcast %cst_12 : f32 to vector<32x128xf32>
      %20 = arith.cmpf oge, %18, %19 : vector<32x128xf32>
      %cst_13 = arith.constant 2.000000e-01 : f32
      %21 = vector.broadcast %cst_13 : f32 to vector<32x128xf32>
      %22 = arith.mulf %21, %18 : vector<32x128xf32>
      %23 = arith.select %20, %18, %22 : vector<32x128xi1>, vector<32x128xf32>
      %24 = arith.truncf %23 : vector<32x128xf32> to vector<32x128xbf16>
      %c0_14 = arith.constant 0 : index
      %c0_15 = arith.constant 0 : index
      %25 = vector.load %arg6[%c0_14, %c0_15] : memref<32x128xbf16, #tpu.memory_space<vmem>>, vector<32x128xbf16>
      tpu.vector_store %arg6[%c0_14, %c0_15], %24 {strides = array<i32>} : memref<32x128xbf16, #tpu.memory_space<vmem>>, vector<32x128xbf16>,
    } else {
    }
    return
  }
  func.func @transform_0(%arg0: i32, %arg1: i32, %arg2: i32) -> (i32, i32) {
    %c0_i32 = arith.constant 0 : i32
    return %arg1, %arg2 : i32, i32
  }
  func.func @transform_1(%arg0: i32, %arg1: i32, %arg2: i32) -> (i32, i32) {
    %c0_i32 = arith.constant 0 : i32
    %c0_i32_0 = arith.constant 0 : i32
    return %c0_i32, %arg0 : i32, i32
  }
  func.func @transform_2(%arg0: i32, %arg1: i32, %arg2: i32) -> (i32, i32) {
    %c0_i32 = arith.constant 0 : i32
    %c0_i32_0 = arith.constant 0 : i32
    return %c0_i32, %arg0 : i32, i32
  }
  func.func @transform_3(%arg0: i32, %arg1: i32, %arg2: i32) -> (i32, i32) {
    %c0_i32 = arith.constant 0 : i32
    return %arg1, %arg0 : i32, i32
  }
}

module attributes {stable_mosaic.version = 11 : i64} {
  func.func @_fused_matmul_kernel(%arg0: i32, %arg1: i32, %arg2: i32, %arg3: memref<16x512xbf16, #tpu.memory_space<vmem>>, %arg4: memref<2048x128xbf16, #tpu.memory_space<vmem>>, %arg5: memref<1x128xf32, #tpu.memory_space<vmem>>, %arg6: memref<16x128xf32, #tpu.memory_space<vmem>>, %arg7: memref<16x128xf32, #tpu.memory_space<vmem>>) attributes {dimension_semantics = [#tpu.dimension_semantics<parallel>, #tpu.dimension_semantics<parallel>, #tpu.dimension_semantics<arbitrary>], iteration_bounds = array<i64: 1, 1, 4>, scalar_prefetch = 0 : i64, scratch_operands = 1 : i64, tpu.core_type = #tpu.core_type<tc>, window_params = [{transform_indices = @transform_0, window_bounds = array<i64: 16, 512>}, {transform_indices = @transform_1, window_bounds = array<i64: 2048, 128>}, {transform_indices = @transform_2, window_bounds = array<i64: 1, 128>}, {transform_indices = @transform_3, window_bounds = array<i64: 16, 128>}]} {
    %c0_i32 = arith.constant 0 : i32
    %0 = arith.cmpi eq, %arg2, %c0_i32 : i32
    %1 = arith.extui %0 : i1 to i32
    %c0_i32_0 = arith.constant 0 : i32
    %2 = arith.cmpi ne, %1, %c0_i32_0 : i32
    scf.if %2 {
      %cst_8 = arith.constant 0.000000e+00 : f32
      %15 = vector.broadcast %cst_8 : f32 to vector<16x128xf32>
      %c0_9 = arith.constant 0 : index
      %c0_10 = arith.constant 0 : index
      %16 = vector.load %arg7[%c0_9, %c0_10] : memref<16x128xf32, #tpu.memory_space<vmem>>, vector<16x128xf32>
      tpu.vector_store %arg7[%c0_9, %c0_10], %15 {strides = array<i32>} : memref<16x128xf32, #tpu.memory_space<vmem>>, vector<16x128xf32>,
    } else {
    }
    %c512_i32 = arith.constant 512 : i32
    %3 = arith.muli %arg2, %c512_i32 : i32
    %4 = tpu.assume_multiple %3, 512 : i32
    %c0 = arith.constant 0 : index
    %c0_1 = arith.constant 0 : index
    %5 = vector.load %arg7[%c0, %c0_1] : memref<16x128xf32, #tpu.memory_space<vmem>>, vector<16x128xf32>
    %c0_2 = arith.constant 0 : index
    %c0_3 = arith.constant 0 : index
    %6 = vector.load %arg3[%c0_2, %c0_3] : memref<16x512xbf16, #tpu.memory_space<vmem>>, vector<16x512xbf16>
    %7 = arith.index_cast %4 : i32 to index
    %c0_4 = arith.constant 0 : index
    %8 = vector.load %arg4[%7, %c0_4] : memref<2048x128xbf16, #tpu.memory_space<vmem>>, vector<512x128xbf16>
    %cst = arith.constant dense<0.000000e+00> : vector<16x128xf32>
    %9 = tpu.matmul %6, %8, %cst {dimension_numbers = #tpu.dot_dimension_numbers<[1], [0], [0], [1], [0, 0, 1, 1], [], []>} : vector<16x512xbf16>, vector<512x128xbf16>, vector<16x128xf32> -> vector<16x128xf32>
    %10 = arith.addf %5, %9 : vector<16x128xf32>
    %c0_5 = arith.constant 0 : index
    %c0_6 = arith.constant 0 : index
    %11 = vector.load %arg7[%c0_5, %c0_6] : memref<16x128xf32, #tpu.memory_space<vmem>>, vector<16x128xf32>
    tpu.vector_store %arg7[%c0_5, %c0_6], %10 {strides = array<i32>} : memref<16x128xf32, #tpu.memory_space<vmem>>, vector<16x128xf32>,
    %c3_i32 = arith.constant 3 : i32
    %12 = arith.cmpi eq, %arg2, %c3_i32 : i32
    %13 = arith.extui %12 : i1 to i32
    %c0_i32_7 = arith.constant 0 : i32
    %14 = arith.cmpi ne, %13, %c0_i32_7 : i32
    scf.if %14 {
      %c0_8 = arith.constant 0 : index
      %c0_9 = arith.constant 0 : index
      %15 = vector.load %arg7[%c0_8, %c0_9] : memref<16x128xf32, #tpu.memory_space<vmem>>, vector<16x128xf32>
      %c0_10 = arith.constant 0 : index
      %c0_11 = arith.constant 0 : index
      %16 = vector.load %arg5[%c0_10, %c0_11] : memref<1x128xf32, #tpu.memory_space<vmem>>, vector<1x128xf32>
      %17 = vector.broadcast %16 : vector<1x128xf32> to vector<16x128xf32>
      %18 = arith.addf %15, %17 : vector<16x128xf32>
      %c0_12 = arith.constant 0 : index
      %c0_13 = arith.constant 0 : index
      %19 = vector.load %arg6[%c0_12, %c0_13] : memref<16x128xf32, #tpu.memory_space<vmem>>, vector<16x128xf32>
      tpu.vector_store %arg6[%c0_12, %c0_13], %18 {strides = array<i32>} : memref<16x128xf32, #tpu.memory_space<vmem>>, vector<16x128xf32>,
    } else {
    }
    return
  }
  func.func @transform_0(%arg0: i32, %arg1: i32, %arg2: i32) -> (i32, i32) {
    %c0_i32 = arith.constant 0 : i32
    return %arg1, %arg2 : i32, i32
  }
  func.func @transform_1(%arg0: i32, %arg1: i32, %arg2: i32) -> (i32, i32) {
    %c0_i32 = arith.constant 0 : i32
    %c0_i32_0 = arith.constant 0 : i32
    return %c0_i32, %arg0 : i32, i32
  }
  func.func @transform_2(%arg0: i32, %arg1: i32, %arg2: i32) -> (i32, i32) {
    %c0_i32 = arith.constant 0 : i32
    %c0_i32_0 = arith.constant 0 : i32
    return %c0_i32, %arg0 : i32, i32
  }
  func.func @transform_3(%arg0: i32, %arg1: i32, %arg2: i32) -> (i32, i32) {
    %c0_i32 = arith.constant 0 : i32
    return %arg1, %arg0 : i32, i32
  }
}

</mosaic_0001>

<bundles_post_ra>
// kernel: a_call__.5
= control target key start
LH: loop header
LB: loop body
LE: loop exit
PB: predicated region body
PF: predicated region fallthrough
CT: control target
= control target key end

     0   :  { %s1435_s12 = smov 0   ;;  %s1437_s13 = smov 0   ;;  %s1726_s0 = inlined_call_operand.vmem [shape: bf16[512,48], index: 0, kind: input, shape index: {}]   ;;  %s1727_s1 = inlined_call_operand.vmem [shape: bf16[48,16], index: 1, kind: input, shape index: {}]   ;;  %s1728_s2 = inlined_call_operand.vmem [shape: f32[1,16], index: 2, kind: input, shape index: {}]   ;;  %s1729_s3 = inlined_call_operand.vmem [shape: bf16[512,16], index: 3, kind: output, shape index: {}]  }
   0x1   :  { %s1439_s14 = smov 0  }
   0x2 LB: > { %s28_s15 = sadd.s32 1, %s1408_s13  ;;  %p1176_p0 = scmp.ge.s32.totalorder %s1412_s14, 1  ;;  %s1412_s14 = sphi %s1439_s14, %s13_s14   ;;  %s1408_s13 = sphi %s1437_s13, %s1731_s13   ;;  %s1404_s12 = sphi %s1435_s12, %s1730_s12  }
   0x3   : > { %p30_p1 = scmp.ge.s32.totalorder %s28_s15, 2  ;;  %p181_p2 = scmp.lt.s32.totalorder %s1412_s14, 3 }
   0x5   : > { %s1733_s15 = smov (%p30_p1, %s28_s15), 0  ;;  %p182_p3 = pnand %p1176_p0, %p181_p2 }
   0x6   : > { %s1177_s18 = sshll.u32 (!%p182_p3), %s1404_s12, 5 }
   0x7   : > { %185 = sbr.rel (%p182_p3) target bundleno = 282 (0x11a), region = 32  ;;  %p219_p4 = scmp.lt.s32.totalorder (!%p182_p3), %s1177_s18, 63 }
   0xc   : > { %v1371_v0 = vld [vmem:[%s1727_s1 + $0x10] sm:$0xff]   ;;  %v1372_v1 = vld [vmem:[%s1727_s1 + $0x8] sm:$0xff]   ;;  %s1735_s18 = smov (!%p219_p4, %s1177_s18), 63  ;;  %vm248_vm0 = vcmask 130048   ;;  %v1373_v2 = vld [vmem:[%s1727_s1] sm:$0xff]   ;;  %v1414_v3 = vmov 0.0  }
   0xd   : > { %1302 = vmatprep.subr.bf16.mxu0 %v1371_v0  ;;  %1340 = vmatprep.subr.bf16.mxu1 %v1371_v0  ;;  %251 = vst.msk [vmem:[#allocation2 + $0x10] sm:$0xff] %vm248_vm0, %v1414_v3  ;;  %249 = vst.msk [vmem:[#allocation2] sm:$0xff] %vm248_vm0, %v1414_v3  ;;  %s1178_s23 = sshll.u32 %s1735_s18, 2  ;;  %vm454_vm1 = vcmask 392192   ;;  %v1545_v46 = vld [vmem:[%s1728_s2] ss:$0 sm:$0xff] }
   0xe   : > { %1303 = vmatpush3.bf16.msra.mxu0 %v1371_v0  ;;  %1343 = vmatpush3.bf16.msra.mxu1 %v1371_v0  ;;  %250 = vst.msk [vmem:[#allocation2 + $0x8] sm:$0xff] %vm248_vm0, %v1414_v3  ;;  %252 = vst.msk [vmem:[#allocation2 + $0x18] sm:$0xff] %vm248_vm0, %v1414_v3  ;;  %s1502_s26 = scalar_lea.vmem %s1726_s0, %s1178_s23  ;;  %vm1027_vm2 = vcmask 125952   ;;  %s1562_s4 = scalar_lea.vmem %s1729_s3, %s1178_s23 }
   0xf   : > { %1304 = vmatprep.subr.bf16.mxu0 %v1372_v1  ;;  %1341 = vmatprep.subr.bf16.mxu1 %v1372_v1  ;;  %253 = vst.msk [vmem:[#allocation2 + $0x20] sm:$0xff] %vm248_vm0, %v1414_v3  ;;  %254 = vst.msk [vmem:[#allocation2 + $0x28] sm:$0xff] %vm248_vm0, %v1414_v3  ;;  %v1374_v4 = vld [vmem:[%s1502_s26] sm:$0xff]   ;;  %v1376_v6 = vld [vmem:[%s1502_s26 + $0x8] sm:$0xff]  }
  0x10   : > { %255 = vst.msk [vmem:[#allocation2 + $0x30] sm:$0xff] %vm248_vm0, %v1414_v3  ;;  %256 = vst.msk [vmem:[#allocation2 + $0x38] sm:$0xff] %vm248_vm0, %v1414_v3  ;;  %v1375_v5 = vld [vmem:[%s1502_s26 + $0x40] sm:$0xff]   ;;  %1308 = vmatprep.mubr.msk.bf16.mxu0 %vm454_vm1, %v1374_v4  ;;  %v1377_v7 = vld [vmem:[%s1502_s26 + $0x48] sm:$0xff]  }
  0x11   : > { %257 = vst.msk [vmem:[#allocation2 + $0x40] sm:$0xff] %vm248_vm0, %v1414_v3  ;;  %258 = vst.msk [vmem:[#allocation2 + $0x48] sm:$0xff] %vm248_vm0, %v1414_v3  ;;  %1324 = vmatprep.mubr.msk.bf16.mxu1 %vm454_vm1, %v1375_v5  ;;  %v1378_v8 = vld [vmem:[%s1502_s26 + $0x10] sm:$0xff]   ;;  %v1380_v10 = vld [vmem:[%s1502_s26 + $0x18] sm:$0xff]  }
  0x12   : > { %259 = vst.msk [vmem:[#allocation2 + $0x50] sm:$0xff] %vm248_vm0, %v1414_v3  ;;  %260 = vst.msk [vmem:[#allocation2 + $0x58] sm:$0xff] %vm248_vm0, %v1414_v3  ;;  %1305 = vmatpush3.bf16.msra.mxu0 %v1372_v1  ;;  %1344 = vmatpush3.bf16.msra.mxu1 %v1372_v1  ;;  %v1379_v9 = vld [vmem:[%s1502_s26 + $0x50] sm:$0xff]   ;;  %v1381_v11 = vld [vmem:[%s1502_s26 + $0x58] sm:$0xff]  }
  0x13   : > { %261 = vst.msk [vmem:[#allocation2 + $0x60] sm:$0xff] %vm248_vm0, %v1414_v3  ;;  %262 = vst.msk [vmem:[#allocation2 + $0x68] sm:$0xff] %vm248_vm0, %v1414_v3  ;;  %1306 = vmatprep.subr.bf16.mxu0 %v1373_v2  ;;  %1342 = vmatprep.subr.bf16.mxu1 %v1373_v2  ;;  %v1382_v12 = vld [vmem:[%s1502_s26 + $0x20] sm:$0xff]   ;;  %v1384_v14 = vld [vmem:[%s1502_s26 + $0x28] sm:$0xff]  }
  0x14   : > { %263 = vst.msk [vmem:[#allocation2 + $0x70] sm:$0xff] %vm248_vm0, %v1414_v3  ;;  %264 = vst.msk [vmem:[#allocation2 + $0x78] sm:$0xff] %vm248_vm0, %v1414_v3  ;;  %v1383_v13 = vld [vmem:[%s1502_s26 + $0x60] sm:$0xff]   ;;  %v1385_v15 = vld [vmem:[%s1502_s26 + $0x68] sm:$0xff]  }
  0x15   : > { %265 = vst.msk [vmem:[#allocation2 + $0x80] sm:$0xff] %vm248_vm0, %v1414_v3  ;;  %266 = vst.msk [vmem:[#allocation2 + $0x88] sm:$0xff] %vm248_vm0, %v1414_v3  ;;  %v1386_v16 = vld [vmem:[%s1502_s26 + $0x30] sm:$0xff]   ;;  %v1388_v18 = vld [vmem:[%s1502_s26 + $0x38] sm:$0xff]  }
  0x16   : > { %267 = vst.msk [vmem:[#allocation2 + $0x90] sm:$0xff] %vm248_vm0, %v1414_v3  ;;  %268 = vst.msk [vmem:[#allocation2 + $0x98] sm:$0xff] %vm248_vm0, %v1414_v3  ;;  %1307 = vmatpush3.bf16.msra.mxu0 %v1373_v2  ;;  %1345 = vmatpush3.bf16.msra.mxu1 %v1373_v2  ;;  %v1387_v17 = vld [vmem:[%s1502_s26 + $0x70] sm:$0xff]   ;;  %v1389_v19 = vld [vmem:[%s1502_s26 + $0x78] sm:$0xff]  }
  0x17   : > { %269 = vst.msk [vmem:[#allocation2 + $0xa0] sm:$0xff] %vm248_vm0, %v1414_v3  ;;  %270 = vst.msk [vmem:[#allocation2 + $0xa8] sm:$0xff] %vm248_vm0, %v1414_v3  ;;  %v284_v20 = vld [vmem:[#allocation2 + $0x10] sm:$0xff]  ;;  %v282_v24 = vld [vmem:[#allocation2] sm:$0xff] }
  0x18   : > { %271 = vst.msk [vmem:[#allocation2 + $0xb0] sm:$0xff] %vm248_vm0, %v1414_v3  ;;  %272 = vst.msk [vmem:[#allocation2 + $0xb8] sm:$0xff] %vm248_vm0, %v1414_v3  ;;  %v285_v30 = vld [vmem:[#allocation2 + $0x18] sm:$0xff]  ;;  %v283_v36 = vld [vmem:[#allocation2 + $0x8] sm:$0xff] }
  0x19   : > { %273 = vst.msk [vmem:[#allocation2 + $0xc0] sm:$0xff] %vm248_vm0, %v1414_v3  ;;  %274 = vst.msk [vmem:[#allocation2 + $0xc8] sm:$0xff] %vm248_vm0, %v1414_v3  ;;  %1309 = vmatmul.mubr.msk.bf16.vlgmr.msra.gmra.mxu0 %vm454_vm1, %v1376_v6  ;;  %1325 = vmatmul.mubr.msk.bf16.vlgmr.msra.gmra.mxu1 %vm454_vm1, %v1377_v7  ;;  %v288_v42 = vld [vmem:[#allocation2 + $0x30] sm:$0xff]  ;;  %v286_v49 = vld [vmem:[#allocation2 + $0x20] sm:$0xff] }
  0x1a   : > { %275 = vst.msk [vmem:[#allocation2 + $0xd0] sm:$0xff] %vm248_vm0, %v1414_v3  ;;  %276 = vst.msk [vmem:[#allocation2 + $0xd8] sm:$0xff] %vm248_vm0, %v1414_v3  ;;  %1312 = vmatprep.mubr.msk.bf16.mxu0 %vm454_vm1, %v1378_v8  ;;  %1328 = vmatprep.mubr.msk.bf16.mxu1 %vm454_vm1, %v1379_v9  ;;  %v289_v61 = vld [vmem:[#allocation2 + $0x38] sm:$0xff] }
  0x1b   : > { %277 = vst.msk [vmem:[#allocation2 + $0xe0] sm:$0xff] %vm248_vm0, %v1414_v3  ;;  %278 = vst.msk [vmem:[#allocation2 + $0xe8] sm:$0xff] %vm248_vm0, %v1414_v3 }
  0x1c   : > { %279 = vst.msk [vmem:[#allocation2 + $0xf0] sm:$0xff] %vm248_vm0, %v1414_v3  ;;  %280 = vst.msk [vmem:[#allocation2 + $0xf8] sm:$0xff] %vm248_vm0, %v1414_v3  ;;  %v298_v25 = vld [vmem:[#allocation2 + $0x80] sm:$0xff]  ;;  %v299_v37 = vld [vmem:[#allocation2 + $0x88] sm:$0xff] }
  0x1d   : > { %v300_v21 = vld [vmem:[#allocation2 + $0x90] sm:$0xff]  ;;  %v301_v31 = vld [vmem:[#allocation2 + $0x98] sm:$0xff] }
  0x1e   : > { %v302_v50 = vld [vmem:[#allocation2 + $0xa0] sm:$0xff] }
  0x1f   : > { %v304_v43 = vld [vmem:[#allocation2 + $0xb0] sm:$0xff]  ;;  %v305_v62 = vld [vmem:[#allocation2 + $0xb8] sm:$0xff] }
  0x21   : > { %1313 = vmatmul.mubr.msk.bf16.gmra.mxu0 %vm454_vm1, %v1380_v10  ;;  %1329 = vmatmul.mubr.msk.bf16.gmra.mxu1 %vm454_vm1, %v1381_v11 }
  0x22   : > { %1316 = vmatprep.mubr.msk.bf16.mxu0 %vm454_vm1, %v1382_v12  ;;  %1332 = vmatprep.mubr.msk.bf16.mxu1 %vm454_vm1, %v1383_v13 }
  0x29   : > { %1317 = vmatmul.mubr.msk.bf16.gmra.mxu0 %vm454_vm1, %v1384_v14  ;;  %1333 = vmatmul.mubr.msk.bf16.gmra.mxu1 %vm454_vm1, %v1385_v15 }
  0x2a   : > { %1320 = vmatprep.mubr.msk.bf16.mxu0 %vm454_vm1, %v1386_v16  ;;  %1336 = vmatprep.mubr.msk.bf16.mxu1 %vm454_vm1, %v1387_v17 }
  0x31   : > { %1321 = vmatmul.mubr.msk.bf16.gmra.mxu0 %vm454_vm1, %v1388_v18  ;;  %1337 = vmatmul.mubr.msk.bf16.gmra.mxu1 %vm454_vm1, %v1389_v19 }
  0xd9   : > { %v1310_v22 = vpop.f32.mrf.mxu0  ;;  %v1326_v23 = vpop.f32.mrf.mxu1 }
  0xda   : > { %v666_v26 = vadd.f32 %v1310_v22, %v284_v20  ;;  %v682_v27 = vadd.f32 %v1326_v23, %v300_v21 }
  0xdb   : > { %v537_v28 = vpop.f32.mrf.mxu0  ;;  %v601_v29 = vpop.f32.mrf.mxu1 }
  0xdc   : > { %699 = vst.msk [vmem:[#allocation2 + $0x10] sm:$0xff] %vm248_vm0, %v666_v26  ;;  %715 = vst.msk [vmem:[#allocation2 + $0x90] sm:$0xff] %vm248_vm0, %v682_v27  ;;  %v664_v32 = vadd.f32 %v537_v28, %v282_v24  ;;  %v680_v33 = vadd.f32 %v601_v29, %v298_v25 }
  0xdd   : > { %v1311_v34 = vpop.f32.mrf.mxu0  ;;  %v1327_v35 = vpop.f32.mrf.mxu1 }
  0xde   : > { %697 = vst.msk [vmem:[#allocation2] sm:$0xff] %vm248_vm0, %v664_v32  ;;  %713 = vst.msk [vmem:[#allocation2 + $0x80] sm:$0xff] %vm248_vm0, %v680_v33  ;;  %v667_v38 = vadd.f32 %v1311_v34, %v285_v30  ;;  %v683_v39 = vadd.f32 %v1327_v35, %v301_v31 }
  0xdf   : > { %v540_v40 = vpop.f32.mrf.mxu0  ;;  %v604_v41 = vpop.f32.mrf.mxu1 }
  0xe0   : > { %700 = vst.msk [vmem:[#allocation2 + $0x18] sm:$0xff] %vm248_vm0, %v667_v38  ;;  %716 = vst.msk [vmem:[#allocation2 + $0x98] sm:$0xff] %vm248_vm0, %v683_v39  ;;  %v665_v44 = vadd.f32 %v540_v40, %v283_v36  ;;  %v681_v45 = vadd.f32 %v604_v41, %v299_v37  ;;  %v287_v37 = vld [vmem:[#allocation2 + $0x28] sm:$0xff] }
  0xe1   : > { %v1314_v47 = vpop.f32.mrf.mxu0  ;;  %v1330_v48 = vpop.f32.mrf.mxu1 }
  0xe2   : > { %698 = vst.msk [vmem:[#allocation2 + $0x8] sm:$0xff] %vm248_vm0, %v665_v44  ;;  %714 = vst.msk [vmem:[#allocation2 + $0x88] sm:$0xff] %vm248_vm0, %v681_v45  ;;  %v670_v51 = vadd.f32 %v1314_v47, %v288_v42  ;;  %v686_v52 = vadd.f32 %v1330_v48, %v304_v43  ;;  %v303_v43 = vld [vmem:[#allocation2 + $0xa8] sm:$0xff] }
  0xe3   : > { %v734_v53 = vld [vmem:[#allocation2 + $0x10] sm:$0xff]  ;;  %v553_v55 = vpop.f32.mrf.mxu0  ;;  %v617_v56 = vpop.f32.mrf.mxu1 }
  0xe4   : > { %v750_v54 = vld [vmem:[#allocation2 + $0x90] sm:$0xff]  ;;  %v773_v57 = vadd.f32 %v1545_v46, %v734_v53  ;;  %703 = vst.msk [vmem:[#allocation2 + $0x30] sm:$0xff] %vm248_vm0, %v670_v51  ;;  %719 = vst.msk [vmem:[#allocation2 + $0xb0] sm:$0xff] %vm248_vm0, %v686_v52  ;;  %v668_v59 = vadd.f32 %v553_v55, %v286_v49  ;;  %v684_v60 = vadd.f32 %v617_v56, %v302_v50 }
  0xe5   : > { %v789_v58 = vadd.f32 %v1545_v46, %v750_v54  ;;  %v732_v63 = vld [vmem:[#allocation2] sm:$0xff]  ;;  %v1315_v1 = vpop.f32.mrf.mxu0  ;;  %v1331_v2 = vpop.f32.mrf.mxu1 }
  0xe6   : > { %v748_v0 = vld [vmem:[#allocation2 + $0x80] sm:$0xff]  ;;  %vm805_vm3 = vcmp.ge.f32.partialorder %v773_v57, 0.0  ;;  %v837_v3 = vmul.f32 0.2, %v773_v57  ;;  %701 = vst.msk [vmem:[#allocation2 + $0x20] sm:$0xff] %vm248_vm0, %v668_v59  ;;  %717 = vst.msk [vmem:[#allocation2 + $0xa0] sm:$0xff] %vm248_vm0, %v684_v60  ;;  %v771_v5 = vadd.f32 %v1545_v46, %v732_v63  ;;  %v671_v9 = vadd.f32 %v1315_v1, %v289_v61 }
  0xe7   : > { %vm821_vm4 = vcmp.ge.f32.partialorder %v789_v58, 0.0  ;;  %v853_v4 = vmul.f32 0.2, %v789_v58  ;;  %v787_v6 = vadd.f32 %v1545_v46, %v748_v0  ;;  %v735_v7 = vld [vmem:[#allocation2 + $0x18] sm:$0xff]  ;;  %v687_v10 = vadd.f32 %v1331_v2, %v305_v62  ;;  %v556_v11 = vpop.f32.mrf.mxu0  ;;  %v620_v12 = vpop.f32.mrf.mxu1 }
  0xe8   : > { %v751_v8 = vld [vmem:[#allocation2 + $0x98] sm:$0xff]  ;;  %v869_v13 = vsel %vm805_vm3, %v773_v57, %v837_v3  ;;  %v774_v15 = vadd.f32 %v1545_v46, %v735_v7  ;;  %vm803_vm5 = vcmp.ge.f32.partialorder %v771_v5, 0.0  ;;  %v835_v19 = vmul.f32 0.2, %v771_v5  ;;  %704 = vst.msk [vmem:[#allocation2 + $0x38] sm:$0xff] %vm248_vm0, %v671_v9 }
  0xe9   : > { %v885_v14 = vsel %vm821_vm4, %v789_v58, %v853_v4  ;;  %v790_v16 = vadd.f32 %v1545_v46, %v751_v8  ;;  %v1253_v17 = vpack.c.bf16 %v869_v13, %v869_v13  ;;  %v733_v20 = vld [vmem:[#allocation2 + $0x8] sm:$0xff]  ;;  %720 = vst.msk [vmem:[#allocation2 + $0xb8] sm:$0xff] %vm248_vm0, %v687_v10  ;;  %v1568_v22 = vpop.f32.mrf.mxu0  ;;  %v1570_v23 = vpop.f32.mrf.mxu1  ;;  %vm819_vm6 = vcmp.ge.f32.partialorder %v787_v6, 0.0  ;;  %v292_v8 = vld [vmem:[#allocation2 + $0x50] sm:$0xff] }
  0xea   : > { %v1269_v18 = vpack.c.bf16 %v885_v14, %v885_v14  ;;  %v749_v21 = vld [vmem:[#allocation2 + $0x88] sm:$0xff]  ;;  %v851_v24 = vmul.f32 0.2, %v787_v6  ;;  %vm806_vm7 = vcmp.ge.f32.partialorder %v774_v15, 0.0  ;;  %v838_v25 = vmul.f32 0.2, %v774_v15 }
  0xeb   : > { %1030 = vst.msk [vmem:[%s1562_s4 + $0x8] sm:$0xf] %vm1027_vm2, %v1253_v17  ;;  %v867_v26 = vsel %vm803_vm5, %v771_v5, %v835_v19  ;;  %vm822_vm8 = vcmp.ge.f32.partialorder %v790_v16, 0.0  ;;  %v854_v27 = vmul.f32 0.2, %v790_v16  ;;  %v772_v28 = vadd.f32 %v1545_v46, %v733_v20  ;;  %v1577_v29 = vpop.f32.mrf.mxu0  ;;  %v1579_v30 = vpop.f32.mrf.mxu1  ;;  %v738_v35 = vld [vmem:[#allocation2 + $0x30] sm:$0xff] }
  0xec   : > { %1046 = vst.msk [vmem:[%s1562_s4 + $0x48] sm:$0xf] %vm1027_vm2, %v1269_v18  ;;  %v1251_v31 = vpack.c.bf16 %v867_v26, %v867_v26  ;;  %v883_v32 = vsel %vm819_vm6, %v787_v6, %v851_v24  ;;  %v870_v33 = vsel %vm806_vm7, %v774_v15, %v838_v25  ;;  %v788_v34 = vadd.f32 %v1545_v46, %v749_v21  ;;  %v754_v36 = vld [vmem:[#allocation2 + $0xb0] sm:$0xff]  ;;  %v306_v17 = vld [vmem:[#allocation2 + $0xc0] sm:$0xff]  ;;  %v293_v21 = vld [vmem:[#allocation2 + $0x58] sm:$0xff] }
  0xed   : > { %v1267_v38 = vpack.c.bf16 %v883_v32, %v883_v32  ;;  %v1254_v39 = vpack.c.bf16 %v870_v33, %v870_v33  ;;  %v886_v40 = vsel %vm822_vm8, %v790_v16, %v854_v27  ;;  %vm804_vm9 = vcmp.ge.f32.partialorder %v772_v28, 0.0  ;;  %v736_v41 = vld [vmem:[#allocation2 + $0x20] sm:$0xff]  ;;  %v1582_v44 = vpop.f32.mrf.mxu0  ;;  %v1584_v45 = vpop.f32.mrf.mxu1  ;;  %v308_v15 = vld [vmem:[#allocation2 + $0xd0] sm:$0xff]  ;;  %v309_v24 = vld [vmem:[#allocation2 + $0xd8] sm:$0xff] }
  0xee   : > { %v752_v42 = vld [vmem:[#allocation2 + $0xa0] sm:$0xff]  ;;  %1028 = vst.msk [vmem:[%s1562_s4] sm:$0xf] %vm1027_vm2, %v1251_v31  ;;  %v1270_v47 = vpack.c.bf16 %v886_v40, %v886_v40  ;;  %v836_v48 = vmul.f32 0.2, %v772_v28  ;;  %vm820_vm10 = vcmp.ge.f32.partialorder %v788_v34, 0.0  ;;  %v777_v50 = vadd.f32 %v1545_v46, %v738_v35 }
  0xef   : > { %v852_v49 = vmul.f32 0.2, %v788_v34  ;;  %1044 = vst.msk [vmem:[%s1562_s4 + $0x40] sm:$0xf] %vm1027_vm2, %v1267_v38  ;;  %1031 = vst.msk [vmem:[%s1562_s4 + $0xc] sm:$0xf] %vm1027_vm2, %v1254_v39  ;;  %v793_v51 = vadd.f32 %v1545_v46, %v754_v36  ;;  %v775_v52 = vadd.f32 %v1545_v46, %v736_v41  ;;  %v791_v53 = vadd.f32 %v1545_v46, %v752_v42  ;;  %v1596_v54 = vpop.f32.mrf.mxu0  ;;  %v1598_v55 = vpop.f32.mrf.mxu1 }
  0xf0   : > { %1047 = vst.msk [vmem:[%s1562_s4 + $0x4c] sm:$0xf] %vm1027_vm2, %v1270_v47  ;;  %v868_v56 = vsel %vm804_vm9, %v772_v28, %v836_v48  ;;  %v739_v58 = vld [vmem:[#allocation2 + $0x38] sm:$0xff]  ;;  %v669_v59 = vadd.f32 %v556_v11, %v287_v37  ;;  %v685_v60 = vadd.f32 %v620_v12, %v303_v43  ;;  %vm809_vm11 = vcmp.ge.f32.partialorder %v777_v50, 0.0  ;;  %v290_v16 = vld [vmem:[#allocation2 + $0x40] sm:$0xff]  ;;  %v291_v25 = vld [vmem:[#allocation2 + $0x48] sm:$0xff] }
  0xf1   : > { %v884_v57 = vsel %vm820_vm10, %v788_v34, %v852_v49  ;;  %v1252_v61 = vpack.c.bf16 %v868_v56, %v868_v56  ;;  %v841_v63 = vmul.f32 0.2, %v777_v50  ;;  %v755_v0 = vld [vmem:[#allocation2 + $0xb8] sm:$0xff]  ;;  %v1603_v1 = vpop.f32.mrf.mxu0  ;;  %v1605_v2 = vpop.f32.mrf.mxu1  ;;  %vm825_vm12 = vcmp.ge.f32.partialorder %v793_v51, 0.0  ;;  %v307_v31 = vld [vmem:[#allocation2 + $0xc8] sm:$0xff]  ;;  %v296_v38 = vld [vmem:[#allocation2 + $0x70] sm:$0xff] }
  0xf2   : > { %v1268_v62 = vpack.c.bf16 %v884_v57, %v884_v57  ;;  %v857_v3 = vmul.f32 0.2, %v793_v51  ;;  %vm807_vm13 = vcmp.ge.f32.partialorder %v775_v52, 0.0  ;;  %v839_v4 = vmul.f32 0.2, %v775_v52  ;;  %702 = vst.msk [vmem:[#allocation2 + $0x28] sm:$0xff] %vm248_vm0, %v669_v59 }
  0xf3   : > { %718 = vst.msk [vmem:[#allocation2 + $0xa8] sm:$0xff] %vm248_vm0, %v685_v60  ;;  %v873_v5 = vsel %vm809_vm11, %v777_v50, %v841_v63  ;;  %vm823_vm14 = vcmp.ge.f32.partialorder %v791_v53, 0.0  ;;  %v855_v6 = vmul.f32 0.2, %v791_v53  ;;  %v778_v7 = vadd.f32 %v1545_v46, %v739_v58  ;;  %v1614_v9 = vpop.f32.mrf.mxu0  ;;  %v1616_v10 = vpop.f32.mrf.mxu1  ;;  %v312_v39 = vld [vmem:[#allocation2 + $0xf0] sm:$0xff]  ;;  %v294_v40 = vld [vmem:[#allocation2 + $0x60] sm:$0xff] }
  0xf4   : > { %1029 = vst.msk [vmem:[%s1562_s4 + $0x4] sm:$0xf] %vm1027_vm2, %v1252_v61  ;;  %1045 = vst.msk [vmem:[%s1562_s4 + $0x44] sm:$0xf] %vm1027_vm2, %v1268_v62  ;;  %v1257_v11 = vpack.c.bf16 %v873_v5, %v873_v5  ;;  %v889_v12 = vsel %vm825_vm12, %v793_v51, %v857_v3  ;;  %v871_v13 = vsel %vm807_vm13, %v775_v52, %v839_v4  ;;  %v297_v48 = vld [vmem:[#allocation2 + $0x78] sm:$0xff]  ;;  %v295_v57 = vld [vmem:[#allocation2 + $0x68] sm:$0xff] }
  0xf5   : > { %v794_v14 = vadd.f32 %v1545_v46, %v755_v0  ;;  %v1273_v18 = vpack.c.bf16 %v889_v12, %v889_v12  ;;  %v1255_v19 = vpack.c.bf16 %v871_v13, %v871_v13  ;;  %v887_v20 = vsel %vm823_vm14, %v791_v53, %v855_v6  ;;  %v1323_v32 = vpop.f32.mrf.mxu0  ;;  %v1339_v33 = vpop.f32.mrf.mxu1  ;;  %v311_v59 = vld [vmem:[#allocation2 + $0xe8] sm:$0xff] }
  0xf6   : > { %vm810_vm15 = vcmp.ge.f32.partialorder %v778_v7, 0.0  ;;  %1034 = vst.msk [vmem:[%s1562_s4 + $0x18] sm:$0xf] %vm1027_vm2, %v1257_v11  ;;  %v1271_v26 = vpack.c.bf16 %v887_v20, %v887_v20  ;;  %v842_v27 = vmul.f32 0.2, %v778_v7  ;;  %v674_v34 = vadd.f32 %v1568_v22, %v292_v8  ;;  %v310_v22 = vld [vmem:[#allocation2 + $0xe0] sm:$0xff] }
  0xf7   : > { %vm826_vm1 = vcmp.ge.f32.partialorder %v794_v14, 0.0  ;;  %v858_v28 = vmul.f32 0.2, %v794_v14  ;;  %1050 = vst.msk [vmem:[%s1562_s4 + $0x58] sm:$0xf] %vm1027_vm2, %v1273_v18  ;;  %v690_v35 = vadd.f32 %v1570_v23, %v308_v15  ;;  %v672_v36 = vadd.f32 %v1577_v29, %v290_v16  ;;  %v313_v23 = vld [vmem:[#allocation2 + $0xf8] sm:$0xff]  ;;  %v588_v58 = vpop.f32.mrf.mxu0  ;;  %v652_v60 = vpop.f32.mrf.mxu1 }
  0xf8   : > { %1032 = vst.msk [vmem:[%s1562_s4 + $0x10] sm:$0xf] %vm1027_vm2, %v1255_v19  ;;  %v688_v37 = vadd.f32 %v1579_v30, %v306_v17  ;;  %1048 = vst.msk [vmem:[%s1562_s4 + $0x50] sm:$0xf] %vm1027_vm2, %v1271_v26  ;;  %v874_v41 = vsel %vm810_vm15, %v778_v7, %v842_v27  ;;  %v675_v43 = vadd.f32 %v1582_v44, %v293_v21 }
  0xf9   : > { %v890_v42 = vsel %vm826_vm1, %v794_v14, %v858_v28  ;;  %v691_v47 = vadd.f32 %v1584_v45, %v309_v24  ;;  %v1258_v49 = vpack.c.bf16 %v874_v41, %v874_v41  ;;  %v737_v50 = vld [vmem:[#allocation2 + $0x28] sm:$0xff]  ;;  %707 = vst.msk [vmem:[#allocation2 + $0x50] sm:$0xff] %vm248_vm0, %v674_v34  ;;  %723 = vst.msk [vmem:[#allocation2 + $0xd0] sm:$0xff] %vm248_vm0, %v690_v35 }
  0xfa   : > { %v1274_v29 = vpack.c.bf16 %v890_v42, %v890_v42  ;;  %v753_v30 = vld [vmem:[#allocation2 + $0xa8] sm:$0xff]  ;;  %705 = vst.msk [vmem:[#allocation2 + $0x40] sm:$0xff] %vm248_vm0, %v672_v36  ;;  %721 = vst.msk [vmem:[#allocation2 + $0xc0] sm:$0xff] %vm248_vm0, %v688_v37  ;;  %v673_v44 = vadd.f32 %v1596_v54, %v291_v25  ;;  %v689_v45 = vadd.f32 %v1598_v55, %v307_v31 }
  0xfb   : > { %v776_v51 = vadd.f32 %v1545_v46, %v737_v50  ;;  %v792_v52 = vadd.f32 %v1545_v46, %v753_v30  ;;  %708 = vst.msk [vmem:[#allocation2 + $0x58] sm:$0xff] %vm248_vm0, %v675_v43  ;;  %724 = vst.msk [vmem:[#allocation2 + $0xd8] sm:$0xff] %vm248_vm0, %v691_v47  ;;  %v678_v53 = vadd.f32 %v1603_v1, %v296_v38 }
  0xfc   : > { %v694_v56 = vadd.f32 %v1605_v2, %v312_v39  ;;  %1035 = vst.msk [vmem:[%s1562_s4 + $0x1c] sm:$0xf] %vm1027_vm2, %v1258_v49  ;;  %1051 = vst.msk [vmem:[%s1562_s4 + $0x5c] sm:$0xf] %vm1027_vm2, %v1274_v29  ;;  %v676_v54 = vadd.f32 %v1614_v9, %v294_v40  ;;  %v692_v55 = vadd.f32 %v1616_v10, %v310_v22 }
  0xfd   : > { %706 = vst.msk [vmem:[#allocation2 + $0x48] sm:$0xff] %vm248_vm0, %v673_v44  ;;  %722 = vst.msk [vmem:[#allocation2 + $0xc8] sm:$0xff] %vm248_vm0, %v689_v45  ;;  %v679_v61 = vadd.f32 %v1323_v32, %v297_v48  ;;  %v695_v62 = vadd.f32 %v1339_v33, %v313_v23  ;;  %vm808_vm3 = vcmp.ge.f32.partialorder %v776_v51, 0.0  ;;  %v840_v63 = vmul.f32 0.2, %v776_v51 }
  0xfe   : > { %vm824_vm4 = vcmp.ge.f32.partialorder %v792_v52, 0.0  ;;  %v856_v0 = vmul.f32 0.2, %v792_v52  ;;  %711 = vst.msk [vmem:[#allocation2 + $0x70] sm:$0xff] %vm248_vm0, %v678_v53  ;;  %727 = vst.msk [vmem:[#allocation2 + $0xf0] sm:$0xff] %vm248_vm0, %v694_v56  ;;  %v677_v1 = vadd.f32 %v588_v58, %v295_v57  ;;  %v693_v2 = vadd.f32 %v652_v60, %v311_v59 }
  0xff   : > { %709 = vst.msk [vmem:[#allocation2 + $0x60] sm:$0xff] %vm248_vm0, %v676_v54  ;;  %725 = vst.msk [vmem:[#allocation2 + $0xe0] sm:$0xff] %vm248_vm0, %v692_v55  ;;  %v872_v3 = vsel %vm808_vm3, %v776_v51, %v840_v63 }
 0x100   : > { %712 = vst.msk [vmem:[#allocation2 + $0x78] sm:$0xff] %vm248_vm0, %v679_v61  ;;  %728 = vst.msk [vmem:[#allocation2 + $0xf8] sm:$0xff] %vm248_vm0, %v695_v62  ;;  %v888_v4 = vsel %vm824_vm4, %v792_v52, %v856_v0  ;;  %v1256_v5 = vpack.c.bf16 %v872_v3, %v872_v3  ;;  %v742_v7 = vld [vmem:[#allocation2 + $0x50] sm:$0xff] }
 0x101   : > { %v1272_v6 = vpack.c.bf16 %v888_v4, %v888_v4  ;;  %710 = vst.msk [vmem:[#allocation2 + $0x68] sm:$0xff] %vm248_vm0, %v677_v1  ;;  %726 = vst.msk [vmem:[#allocation2 + $0xe8] sm:$0xff] %vm248_vm0, %v693_v2  ;;  %v758_v8 = vld [vmem:[#allocation2 + $0xd0] sm:$0xff]  ;;  %v740_v9 = vld [vmem:[#allocation2 + $0x40] sm:$0xff]  ;;  %v781_v10 = vadd.f32 %v1545_v46, %v742_v7 }
 0x102   : > { %1033 = vst.msk [vmem:[%s1562_s4 + $0x14] sm:$0xf] %vm1027_vm2, %v1256_v5  ;;  %v797_v11 = vadd.f32 %v1545_v46, %v758_v8  ;;  %v779_v12 = vadd.f32 %v1545_v46, %v740_v9  ;;  %v756_v13 = vld [vmem:[#allocation2 + $0xc0] sm:$0xff]  ;;  %v743_v14 = vld [vmem:[#allocation2 + $0x58] sm:$0xff] }
 0x103   : > { %1049 = vst.msk [vmem:[%s1562_s4 + $0x54] sm:$0xf] %vm1027_vm2, %v1272_v6  ;;  %v759_v15 = vld [vmem:[#allocation2 + $0xd8] sm:$0xff]  ;;  %v795_v16 = vadd.f32 %v1545_v46, %v756_v13  ;;  %v782_v17 = vadd.f32 %v1545_v46, %v743_v14  ;;  %vm813_vm0 = vcmp.ge.f32.partialorder %v781_v10, 0.0  ;;  %v845_v19 = vmul.f32 0.2, %v781_v10 }
 0x104   : > { %v798_v18 = vadd.f32 %v1545_v46, %v759_v15  ;;  %vm829_vm5 = vcmp.ge.f32.partialorder %v797_v11, 0.0  ;;  %v861_v20 = vmul.f32 0.2, %v797_v11  ;;  %vm811_vm6 = vcmp.ge.f32.partialorder %v779_v12, 0.0  ;;  %v741_v28 = vld [vmem:[#allocation2 + $0x48] sm:$0xff] }
 0x105   : > { %v843_v21 = vmul.f32 0.2, %v779_v12  ;;  %vm827_vm7 = vcmp.ge.f32.partialorder %v795_v16, 0.0  ;;  %v859_v24 = vmul.f32 0.2, %v795_v16  ;;  %v877_v25 = vsel %vm813_vm0, %v781_v10, %v845_v19  ;;  %v757_v31 = vld [vmem:[#allocation2 + $0xc8] sm:$0xff] }
 0x106   : > { %v893_v26 = vsel %vm829_vm5, %v797_v11, %v861_v20  ;;  %vm814_vm8 = vcmp.ge.f32.partialorder %v782_v17, 0.0  ;;  %v846_v27 = vmul.f32 0.2, %v782_v17  ;;  %v746_v32 = vld [vmem:[#allocation2 + $0x70] sm:$0xff]  ;;  %v1261_v33 = vpack.c.bf16 %v877_v25, %v877_v25  ;;  %v744_v38 = vld [vmem:[#allocation2 + $0x60] sm:$0xff] }
 0x107   : > { %v1277_v34 = vpack.c.bf16 %v893_v26, %v893_v26  ;;  %v875_v35 = vsel %vm811_vm6, %v779_v12, %v843_v21  ;;  %v891_v36 = vsel %vm827_vm7, %v795_v16, %v859_v24  ;;  %v762_v37 = vld [vmem:[#allocation2 + $0xf0] sm:$0xff]  ;;  %v760_v39 = vld [vmem:[#allocation2 + $0xe0] sm:$0xff]  ;;  %vm830_vm9 = vcmp.ge.f32.partialorder %v798_v18, 0.0  ;;  %v747_v57 = vld [vmem:[#allocation2 + $0x78] sm:$0xff] }
 0x108   : > { %v1259_v40 = vpack.c.bf16 %v875_v35, %v875_v35  ;;  %v1275_v41 = vpack.c.bf16 %v891_v36, %v891_v36  ;;  %v878_v42 = vsel %vm814_vm8, %v782_v17, %v846_v27  ;;  %1038 = vst.msk [vmem:[%s1562_s4 + $0x28] sm:$0xf] %vm1027_vm2, %v1261_v33  ;;  %v862_v47 = vmul.f32 0.2, %v798_v18  ;;  %v763_v55 = vld [vmem:[#allocation2 + $0xf8] sm:$0xff]  ;;  %v745_v61 = vld [vmem:[#allocation2 + $0x68] sm:$0xff] }
 0x109   : > { %1054 = vst.msk [vmem:[%s1562_s4 + $0x68] sm:$0xf] %vm1027_vm2, %v1277_v34  ;;  %v1262_v43 = vpack.c.bf16 %v878_v42, %v878_v42  ;;  %v780_v22 = vadd.f32 %v1545_v46, %v741_v28  ;;  %v796_v48 = vadd.f32 %v1545_v46, %v757_v31  ;;  %v785_v23 = vadd.f32 %v1545_v46, %v746_v32  ;;  %v761_v62 = vld [vmem:[#allocation2 + $0xe8] sm:$0xff] }
 0x10a   : > { %1036 = vst.msk [vmem:[%s1562_s4 + $0x20] sm:$0xf] %vm1027_vm2, %v1259_v40  ;;  %1052 = vst.msk [vmem:[%s1562_s4 + $0x60] sm:$0xf] %vm1027_vm2, %v1275_v41  ;;  %v801_v49 = vadd.f32 %v1545_v46, %v762_v37  ;;  %v783_v29 = vadd.f32 %v1545_v46, %v744_v38  ;;  %v799_v50 = vadd.f32 %v1545_v46, %v760_v39 }
 0x10b   : > { %1039 = vst.msk [vmem:[%s1562_s4 + $0x2c] sm:$0xf] %vm1027_vm2, %v1262_v43  ;;  %v894_v30 = vsel %vm830_vm9, %v798_v18, %v862_v47  ;;  %vm812_vm10 = vcmp.ge.f32.partialorder %v780_v22, 0.0  ;;  %v844_v44 = vmul.f32 0.2, %v780_v22  ;;  %vm828_vm11 = vcmp.ge.f32.partialorder %v796_v48, 0.0 }
 0x10c   : > { %v1278_v45 = vpack.c.bf16 %v894_v30, %v894_v30  ;;  %v860_v51 = vmul.f32 0.2, %v796_v48  ;;  %vm817_vm12 = vcmp.ge.f32.partialorder %v785_v23, 0.0  ;;  %v849_v52 = vmul.f32 0.2, %v785_v23 }
 0x10d   : > { %v876_v53 = vsel %vm812_vm10, %v780_v22, %v844_v44  ;;  %vm833_vm13 = vcmp.ge.f32.partialorder %v801_v49, 0.0  ;;  %v865_v56 = vmul.f32 0.2, %v801_v49  ;;  %vm815_vm14 = vcmp.ge.f32.partialorder %v783_v29, 0.0 }
 0x10e   : > { %1055 = vst.msk [vmem:[%s1562_s4 + $0x6c] sm:$0xf] %vm1027_vm2, %v1278_v45  ;;  %v1260_v58 = vpack.c.bf16 %v876_v53, %v876_v53  ;;  %v892_v59 = vsel %vm828_vm11, %v796_v48, %v860_v51  ;;  %v881_v60 = vsel %vm817_vm12, %v785_v23, %v849_v52  ;;  %v847_v54 = vmul.f32 0.2, %v783_v29 }
 0x10f   : > { %v1276_v63 = vpack.c.bf16 %v892_v59, %v892_v59  ;;  %v1265_v0 = vpack.c.bf16 %v881_v60, %v881_v60  ;;  %v897_v1 = vsel %vm833_vm13, %v801_v49, %v865_v56  ;;  %vm831_vm15 = vcmp.ge.f32.partialorder %v799_v50, 0.0 }
 0x110   : > { %1037 = vst.msk [vmem:[%s1562_s4 + $0x24] sm:$0xf] %vm1027_vm2, %v1260_v58  ;;  %v1281_v2 = vpack.c.bf16 %v897_v1, %v897_v1  ;;  %v879_v3 = vsel %vm815_vm14, %v783_v29, %v847_v54  ;;  %v863_v4 = vmul.f32 0.2, %v799_v50  ;;  %v786_v5 = vadd.f32 %v1545_v46, %v747_v57 }
 0x111   : > { %1053 = vst.msk [vmem:[%s1562_s4 + $0x64] sm:$0xf] %vm1027_vm2, %v1276_v63  ;;  %1042 = vst.msk [vmem:[%s1562_s4 + $0x38] sm:$0xf] %vm1027_vm2, %v1265_v0  ;;  %v1263_v6 = vpack.c.bf16 %v879_v3, %v879_v3  ;;  %v802_v7 = vadd.f32 %v1545_v46, %v763_v55  ;;  %v784_v8 = vadd.f32 %v1545_v46, %v745_v61 }
 0x112   : > { %v800_v9 = vadd.f32 %v1545_v46, %v761_v62  ;;  %1058 = vst.msk [vmem:[%s1562_s4 + $0x78] sm:$0xf] %vm1027_vm2, %v1281_v2  ;;  %v895_v10 = vsel %vm831_vm15, %v799_v50, %v863_v4  ;;  %vm818_vm1 = vcmp.ge.f32.partialorder %v786_v5, 0.0  ;;  %v850_v11 = vmul.f32 0.2, %v786_v5 }
 0x113   : > { %1040 = vst.msk [vmem:[%s1562_s4 + $0x30] sm:$0xf] %vm1027_vm2, %v1263_v6  ;;  %v1279_v12 = vpack.c.bf16 %v895_v10, %v895_v10  ;;  %vm834_vm3 = vcmp.ge.f32.partialorder %v802_v7, 0.0  ;;  %v866_v13 = vmul.f32 0.2, %v802_v7  ;;  %vm816_vm4 = vcmp.ge.f32.partialorder %v784_v8, 0.0 }
 0x114   : > { %v882_v14 = vsel %vm818_vm1, %v786_v5, %v850_v11  ;;  %v848_v15 = vmul.f32 0.2, %v784_v8  ;;  %vm832_vm0 = vcmp.ge.f32.partialorder %v800_v9, 0.0  ;;  %v864_v16 = vmul.f32 0.2, %v800_v9 }
 0x115   : > { %1056 = vst.msk [vmem:[%s1562_s4 + $0x70] sm:$0xf] %vm1027_vm2, %v1279_v12  ;;  %v1266_v46 = vpack.c.bf16 %v882_v14, %v882_v14  ;;  %v898_v17 = vsel %vm834_vm3, %v802_v7, %v866_v13 }
 0x116   : > { %v1282_v18 = vpack.c.bf16 %v898_v17, %v898_v17  ;;  %v880_v19 = vsel %vm816_vm4, %v784_v8, %v848_v15  ;;  %v896_v20 = vsel %vm832_vm0, %v800_v9, %v864_v16 }
 0x117   : > { %1043 = vst.msk [vmem:[%s1562_s4 + $0x3c] sm:$0xf] %vm1027_vm2, %v1266_v46  ;;  %v1264_v21 = vpack.c.bf16 %v880_v19, %v880_v19  ;;  %v1280_v24 = vpack.c.bf16 %v896_v20, %v896_v20 }
 0x118   : > { %1059 = vst.msk [vmem:[%s1562_s4 + $0x7c] sm:$0xf] %vm1027_vm2, %v1282_v18 }
 0x119   : > { %1041 = vst.msk [vmem:[%s1562_s4 + $0x34] sm:$0xf] %vm1027_vm2, %v1264_v21  ;;  %1057 = vst.msk [vmem:[%s1562_s4 + $0x74] sm:$0xf] %vm1027_vm2, %v1280_v24 }
 0x11a PF: > { %s13_s14 = sadd.s32 1, %s1412_s14   ;;  %s1730_s12 = smov %s1408_s13 }
 0x11b   : > { %p10_p5 = scmp.ge.s32.totalorder %s13_s14, 4   ;;  %s1731_s13 = smov %s1733_s15 }
 0x11d   :  { %12 = sbr.rel (!%p10_p5) target bundleno = 2 (0x2), region = 77 }

// kernel: a_call__.6
= control target key start
LH: loop header
LB: loop body
LE: loop exit
PB: predicated region body
PF: predicated region fallthrough
CT: control target
= control target key end

     0   :  { %vm19_vm0 = vcmask 261120   ;;  %vm886_vm2 = vcmask 257024   ;;  %s1545_s1 = inlined_call_operand.vmem [shape: bf16[512,32], index: 1, kind: input, shape index: {}]   ;;  %s1546_s0 = inlined_call_operand.vmem [shape: bf16[128,512], index: 0, kind: input, shape index: {}]   ;;  %s1547_s2 = inlined_call_operand.vmem [shape: f32[1,32], index: 2, kind: input, shape index: {}]   ;;  %s1548_s3 = inlined_call_operand.vmem [shape: bf16[128,32], index: 3, kind: output, shape index: {}]  }
   0x1   :  { %v1135_v0 = vld [vmem:[%s1545_s1 + $0x78] sm:$0xff]   ;;  %v1139_v4 = vld [vmem:[%s1545_s1 + $0x70] sm:$0xff]   ;;  %v1143_v8 = vld [vmem:[%s1545_s1 + $0x68] sm:$0xff]  }
   0x2   :  { %v1136_v1 = vld [vmem:[%s1545_s1 + $0xf8] sm:$0xff]   ;;  %1006 = vmatprep.subr.bf16.mxu0 %v1135_v0  ;;  %v1140_v5 = vld [vmem:[%s1545_s1 + $0xf0] sm:$0xff]   ;;  %v1144_v9 = vld [vmem:[%s1545_s1 + $0xe8] sm:$0xff]   ;;  %v1215_v0 = vmov 0.0  }
   0x3   :  { %v1137_v2 = vld [vmem:[%s1545_s1 + $0x38] sm:$0xff]   ;;  %1070 = vmatprep.subr.bf16.mxu1 %v1136_v1  ;;  %v1141_v6 = vld [vmem:[%s1545_s1 + $0x30] sm:$0xff]   ;;  %v1145_v10 = vld [vmem:[%s1545_s1 + $0x28] sm:$0xff]   ;;  %20 = vst.msk [vmem:[#allocation2] sm:$0xff] %vm19_vm0, %v1215_v0 }
   0x4   :  { %v1138_v3 = vld [vmem:[%s1545_s1 + $0xb8] sm:$0xff]   ;;  %1007 = vmatpush3.bf16.msra.mxu0 %v1137_v2  ;;  %v1142_v7 = vld [vmem:[%s1545_s1 + $0xb0] sm:$0xff]   ;;  %v1146_v11 = vld [vmem:[%s1545_s1 + $0xa8] sm:$0xff]   ;;  %21 = vst.msk [vmem:[#allocation2 + $0x8] sm:$0xff] %vm19_vm0, %v1215_v0 }
   0x5   :  { %1071 = vmatpush3.bf16.msra.mxu1 %v1138_v3  ;;  %1008 = vmatprep.subr.bf16.mxu0 %v1139_v4  ;;  %v1147_v12 = vld [vmem:[%s1545_s1 + $0x60] sm:$0xff]   ;;  %v1151_v16 = vld [vmem:[%s1545_s1 + $0x58] sm:$0xff]   ;;  %v1155_v20 = vld [vmem:[%s1545_s1 + $0x50] sm:$0xff]   ;;  %22 = vst.msk [vmem:[#allocation2 + $0x10] sm:$0xff] %vm19_vm0, %v1215_v0 }
   0x6   :  { %1072 = vmatprep.subr.bf16.mxu1 %v1140_v5  ;;  %v1148_v13 = vld [vmem:[%s1545_s1 + $0xe0] sm:$0xff]   ;;  %v1152_v17 = vld [vmem:[%s1545_s1 + $0xd8] sm:$0xff]   ;;  %v1156_v21 = vld [vmem:[%s1545_s1 + $0xd0] sm:$0xff]   ;;  %23 = vst.msk [vmem:[#allocation2 + $0x18] sm:$0xff] %vm19_vm0, %v1215_v0 }
   0x7   :  { %v1149_v14 = vld [vmem:[%s1545_s1 + $0x20] sm:$0xff]   ;;  %v1153_v18 = vld [vmem:[%s1545_s1 + $0x18] sm:$0xff]   ;;  %v1157_v22 = vld [vmem:[%s1545_s1 + $0x10] sm:$0xff]   ;;  %24 = vst.msk [vmem:[#allocation2 + $0x20] sm:$0xff] %vm19_vm0, %v1215_v0 }
   0x8   :  { %1009 = vmatpush3.bf16.msra.mxu0 %v1141_v6  ;;  %v1150_v15 = vld [vmem:[%s1545_s1 + $0xa0] sm:$0xff]   ;;  %v1154_v19 = vld [vmem:[%s1545_s1 + $0x98] sm:$0xff]   ;;  %v1158_v23 = vld [vmem:[%s1545_s1 + $0x90] sm:$0xff]   ;;  %25 = vst.msk [vmem:[#allocation2 + $0x28] sm:$0xff] %vm19_vm0, %v1215_v0 }
   0x9   :  { %1073 = vmatpush3.bf16.msra.mxu1 %v1142_v7  ;;  %1010 = vmatprep.subr.bf16.mxu0 %v1143_v8  ;;  %v1159_v24 = vld [vmem:[%s1545_s1 + $0x48] sm:$0xff]   ;;  %v1163_v28 = vld [vmem:[%s1545_s1 + $0x40] sm:$0xff]   ;;  %26 = vst.msk [vmem:[#allocation2 + $0x30] sm:$0xff] %vm19_vm0, %v1215_v0  ;;  %27 = vst.msk [vmem:[#allocation2 + $0x38] sm:$0xff] %vm19_vm0, %v1215_v0 }
   0xa   :  { %1074 = vmatprep.subr.bf16.mxu1 %v1144_v9  ;;  %v1160_v25 = vld [vmem:[%s1545_s1 + $0xc8] sm:$0xff]   ;;  %v1164_v29 = vld [vmem:[%s1545_s1 + $0xc0] sm:$0xff]   ;;  %28 = vst.msk [vmem:[#allocation2 + $0x40] sm:$0xff] %vm19_vm0, %v1215_v0  ;;  %29 = vst.msk [vmem:[#allocation2 + $0x48] sm:$0xff] %vm19_vm0, %v1215_v0 }
   0xb   :  { %v1161_v26 = vld [vmem:[%s1545_s1 + $0x8] sm:$0xff]   ;;  %v1165_v30 = vld [vmem:[%s1545_s1] sm:$0xff]   ;;  %30 = vst.msk [vmem:[#allocation2 + $0x50] sm:$0xff] %vm19_vm0, %v1215_v0  ;;  %31 = vst.msk [vmem:[#allocation2 + $0x58] sm:$0xff] %vm19_vm0, %v1215_v0 }
   0xc   :  { %1011 = vmatpush3.bf16.msra.mxu0 %v1145_v10  ;;  %v1162_v27 = vld [vmem:[%s1545_s1 + $0x88] sm:$0xff]   ;;  %v1166_v31 = vld [vmem:[%s1545_s1 + $0x80] sm:$0xff]   ;;  %32 = vst.msk [vmem:[#allocation2 + $0x60] sm:$0xff] %vm19_vm0, %v1215_v0  ;;  %33 = vst.msk [vmem:[#allocation2 + $0x68] sm:$0xff] %vm19_vm0, %v1215_v0 }
   0xd   :  { %1075 = vmatpush3.bf16.msra.mxu1 %v1146_v11  ;;  %1012 = vmatprep.subr.bf16.mxu0 %v1147_v12  ;;  %v1167_v32 = vld [vmem:[%s1546_s0] ss:$16 sps:$4 sm:$0xff]   ;;  %v1169_v33 = vld [vmem:[%s1546_s0 + $0x4] ss:$16 sps:$4 sm:$0xff]   ;;  %v1170_v34 = vld [vmem:[%s1546_s0 + $0x8] ss:$16 sps:$4 sm:$0xff]  }
   0xe   :  { %1076 = vmatprep.subr.bf16.mxu1 %v1148_v13  ;;  %v1172_v35 = vld [vmem:[%s1546_s0 + $0xc] ss:$16 sps:$4 sm:$0xff]   ;;  %537 = vmatprep.mubr.bf16.mxu0 %v1169_v33  ;;  %v1173_v36 = vld [vmem:[%s1546_s0 + $0x24] ss:$16 sps:$4 sm:$0xff]   ;;  %v1177_v38 = vld [vmem:[%s1546_s0 + $0x20] ss:$16 sps:$4 sm:$0xff]  }
   0xf   :  { %634 = vmatprep.mubr.bf16.mxu1 %v1172_v35  ;;  %v1175_v37 = vld [vmem:[%s1546_s0 + $0x2c] ss:$16 sps:$4 sm:$0xff]   ;;  %v1178_v39 = vld [vmem:[%s1546_s0 + $0x28] ss:$16 sps:$4 sm:$0xff]   ;;  %v1179_v40 = vld [vmem:[%s1546_s0 + $0x44] ss:$16 sps:$4 sm:$0xff]  }
  0x10   :  { %1013 = vmatpush3.bf16.msra.mxu0 %v1149_v14  ;;  %v1181_v41 = vld [vmem:[%s1546_s0 + $0x4c] ss:$16 sps:$4 sm:$0xff]   ;;  %v1183_v42 = vld [vmem:[%s1546_s0 + $0x40] ss:$16 sps:$4 sm:$0xff]   ;;  %v1184_v43 = vld [vmem:[%s1546_s0 + $0x48] ss:$16 sps:$4 sm:$0xff]  }
  0x11   :  { %1077 = vmatpush3.bf16.msra.mxu1 %v1150_v15  ;;  %1014 = vmatprep.subr.bf16.mxu0 %v1151_v16  ;;  %v1185_v44 = vld [vmem:[%s1546_s0 + $0x64] ss:$16 sps:$4 sm:$0xff]   ;;  %v1187_v45 = vld [vmem:[%s1546_s0 + $0x6c] ss:$16 sps:$4 sm:$0xff]   ;;  %v1189_v46 = vld [vmem:[%s1546_s0 + $0x60] ss:$16 sps:$4 sm:$0xff]  }
  0x12   :  { %1078 = vmatprep.subr.bf16.mxu1 %v1152_v17  ;;  %v1190_v47 = vld [vmem:[%s1546_s0 + $0x68] ss:$16 sps:$4 sm:$0xff]   ;;  %v1191_v48 = vld [vmem:[%s1546_s0 + $0x84] ss:$16 sps:$4 sm:$0xff]   ;;  %v1193_v49 = vld [vmem:[%s1546_s0 + $0x8c] ss:$16 sps:$4 sm:$0xff]  }
  0x13   :  { %v1195_v50 = vld [vmem:[%s1546_s0 + $0x80] ss:$16 sps:$4 sm:$0xff]   ;;  %v1196_v51 = vld [vmem:[%s1546_s0 + $0x88] ss:$16 sps:$4 sm:$0xff]   ;;  %v1197_v52 = vld [vmem:[%s1546_s0 + $0xa4] ss:$16 sps:$4 sm:$0xff]  }
  0x14   :  { %1015 = vmatpush3.bf16.msra.mxu0 %v1153_v18  ;;  %v1199_v53 = vld [vmem:[%s1546_s0 + $0xac] ss:$16 sps:$4 sm:$0xff]   ;;  %v1201_v54 = vld [vmem:[%s1546_s0 + $0xa0] ss:$16 sps:$4 sm:$0xff]   ;;  %v1202_v55 = vld [vmem:[%s1546_s0 + $0xa8] ss:$16 sps:$4 sm:$0xff]  }
  0x15   :  { %1079 = vmatpush3.bf16.msra.mxu1 %v1154_v19  ;;  %1016 = vmatprep.subr.bf16.mxu0 %v1155_v20  ;;  %v1203_v56 = vld [vmem:[%s1546_s0 + $0xc4] ss:$16 sps:$4 sm:$0xff]   ;;  %v1205_v57 = vld [vmem:[%s1546_s0 + $0xcc] ss:$16 sps:$4 sm:$0xff]   ;;  %v1207_v58 = vld [vmem:[%s1546_s0 + $0xc0] ss:$16 sps:$4 sm:$0xff]  }
  0x16   :  { %1080 = vmatprep.subr.bf16.mxu1 %v1156_v21  ;;  %v1208_v59 = vld [vmem:[%s1546_s0 + $0xc8] ss:$16 sps:$4 sm:$0xff]   ;;  %v1209_v60 = vld [vmem:[%s1546_s0 + $0xe4] ss:$16 sps:$4 sm:$0xff]   ;;  %v1211_v61 = vld [vmem:[%s1546_s0 + $0xec] ss:$16 sps:$4 sm:$0xff]  }
  0x17   :  { %v1213_v62 = vld [vmem:[%s1546_s0 + $0xe0] ss:$16 sps:$4 sm:$0xff]   ;;  %v1214_v63 = vld [vmem:[%s1546_s0 + $0xe8] ss:$16 sps:$4 sm:$0xff]   ;;  %34 = vst.msk [vmem:[#allocation2 + $0x70] sm:$0xff] %vm19_vm0, %v1215_v0  ;;  %35 = vst.msk [vmem:[#allocation2 + $0x78] sm:$0xff] %vm19_vm0, %v1215_v0 }
  0x18   :  { %1017 = vmatpush3.bf16.msra.mxu0 %v1157_v22  ;;  %v37_v8 = vld [vmem:[#allocation2] sm:$0xff]  ;;  %v38_v17 = vld [vmem:[#allocation2 + $0x8] sm:$0xff] }
  0x19   :  { %1081 = vmatpush3.bf16.msra.mxu1 %v1158_v23  ;;  %1018 = vmatprep.subr.bf16.mxu0 %v1159_v24 }
  0x1a   :  { %1082 = vmatprep.subr.bf16.mxu1 %v1160_v25 }
  0x1c   :  { %1019 = vmatpush3.bf16.msra.mxu0 %v1161_v26  ;;  %v39_v26 = vld [vmem:[#allocation2 + $0x10] sm:$0xff] }
  0x1d   :  { %1083 = vmatpush3.bf16.msra.mxu1 %v1162_v27  ;;  %1020 = vmatprep.subr.bf16.mxu0 %v1163_v28 }
  0x1e   :  { %1084 = vmatprep.subr.bf16.mxu1 %v1164_v29 }
  0x20   :  { %1021 = vmatpush3.bf16.msra.mxu0 %v1165_v30  ;;  %v1449_v30 = vld [vmem:[%s1547_s2] ss:$0 sm:$0xff] }
  0x21   :  { %1085 = vmatpush3.bf16.msra.mxu1 %v1166_v31 }
  0x23   :  { %538 = vmatmul.mubr.bf16.vlgmr.msra.gmra.mxu0 %v1167_v32 }
  0x24   :  { %635 = vmatmul.mubr.bf16.vlgmr.msra.gmra.mxu1 %v1170_v34  ;;  %545 = vmatprep.mubr.bf16.mxu0 %v1173_v36 }
  0x25   :  { %642 = vmatprep.mubr.bf16.mxu1 %v1175_v37  ;;  %v40_v37 = vld [vmem:[#allocation2 + $0x18] sm:$0xff] }
  0x2b   :  { %546 = vmatmul.mubr.bf16.gmra.mxu0 %v1177_v38 }
  0x2c   :  { %643 = vmatmul.mubr.bf16.gmra.mxu1 %v1178_v39  ;;  %553 = vmatprep.mubr.bf16.mxu0 %v1179_v40 }
  0x2d   :  { %650 = vmatprep.mubr.bf16.mxu1 %v1181_v41 }
  0x33   :  { %554 = vmatmul.mubr.bf16.gmra.mxu0 %v1183_v42 }
  0x34   :  { %651 = vmatmul.mubr.bf16.gmra.mxu1 %v1184_v43  ;;  %561 = vmatprep.mubr.bf16.mxu0 %v1185_v44 }
  0x35   :  { %658 = vmatprep.mubr.bf16.mxu1 %v1187_v45 }
  0x3b   :  { %562 = vmatmul.mubr.bf16.gmra.mxu0 %v1189_v46 }
  0x3c   :  { %659 = vmatmul.mubr.bf16.gmra.mxu1 %v1190_v47  ;;  %569 = vmatprep.mubr.bf16.mxu0 %v1191_v48 }
  0x3d   :  { %666 = vmatprep.mubr.bf16.mxu1 %v1193_v49  ;;  %v41_v49 = vld [vmem:[#allocation2 + $0x20] sm:$0xff] }
  0x43   :  { %570 = vmatmul.mubr.bf16.gmra.mxu0 %v1195_v50 }
  0x44   :  { %667 = vmatmul.mubr.bf16.gmra.mxu1 %v1196_v51  ;;  %577 = vmatprep.mubr.bf16.mxu0 %v1197_v52 }
  0x45   :  { %674 = vmatprep.mubr.bf16.mxu1 %v1199_v53 }
  0x4b   :  { %578 = vmatmul.mubr.bf16.gmra.mxu0 %v1201_v54 }
  0x4c   :  { %675 = vmatmul.mubr.bf16.gmra.mxu1 %v1202_v55  ;;  %585 = vmatprep.mubr.bf16.mxu0 %v1203_v56 }
  0x4d   :  { %682 = vmatprep.mubr.bf16.mxu1 %v1205_v57 }
  0x53   :  { %586 = vmatmul.mubr.bf16.gmra.mxu0 %v1207_v58 }
  0x54   :  { %683 = vmatmul.mubr.bf16.gmra.mxu1 %v1208_v59  ;;  %593 = vmatprep.mubr.bf16.mxu0 %v1209_v60 }
  0x55   :  { %690 = vmatprep.mubr.bf16.mxu1 %v1211_v61 }
  0x5b   :  { %594 = vmatmul.mubr.bf16.gmra.mxu0 %v1213_v62 }
  0x5c   :  { %691 = vmatmul.mubr.bf16.gmra.mxu1 %v1214_v63  ;;  %v42_v63 = vld [vmem:[#allocation2 + $0x28] sm:$0xff] }
  0xe3   :  { %v1022_v1 = vpop.f32.mrf.mxu0 }
  0xe4   :  { %v1086_v2 = vpop.f32.mrf.mxu1 }
  0xe5   :  { %v1023_v3 = vpop.f32.mrf.mxu0 }
  0xe6   :  { %v1024_v4 = vadd.f32 %v1023_v3, %v1022_v1  ;;  %v1087_v5 = vpop.f32.mrf.mxu1 }
  0xe7   :  { %v1088_v6 = vadd.f32 %v1087_v5, %v1086_v2  ;;  %v1025_v7 = vpop.f32.mrf.mxu0 }
  0xe8   :  { %v1089_v9 = vpop.f32.mrf.mxu1 }
  0xe9   :  { %v637_v10 = vadd.f32 %v1088_v6, %v1024_v4  ;;  %v1026_v11 = vpop.f32.mrf.mxu0 }
  0xea   :  { %v1027_v12 = vadd.f32 %v1026_v11, %v1025_v7  ;;  %v1090_v13 = vpop.f32.mrf.mxu1 }
  0xeb   :  { %v699_v14 = vadd.f32 %v637_v10, %v37_v8  ;;  %v1091_v15 = vadd.f32 %v1090_v13, %v1089_v9  ;;  %v1028_v16 = vpop.f32.mrf.mxu0  ;;  %v43_v13 = vld [vmem:[#allocation2 + $0x30] sm:$0xff] }
  0xec   :  { %v1092_v18 = vpop.f32.mrf.mxu1 }
  0xed   :  { %716 = vst.msk [vmem:[#allocation2] sm:$0xff] %vm19_vm0, %v699_v14  ;;  %v640_v19 = vadd.f32 %v1091_v15, %v1027_v12  ;;  %v1029_v20 = vpop.f32.mrf.mxu0 }
  0xee   :  { %v1030_v21 = vadd.f32 %v1029_v20, %v1028_v16  ;;  %v1093_v22 = vpop.f32.mrf.mxu1 }
  0xef   :  { %v700_v23 = vadd.f32 %v640_v19, %v38_v17  ;;  %v1094_v24 = vadd.f32 %v1093_v22, %v1092_v18  ;;  %v1031_v25 = vpop.f32.mrf.mxu0 }
  0xf0   :  { %v1095_v27 = vpop.f32.mrf.mxu1 }
  0xf1   :  { %717 = vst.msk [vmem:[#allocation2 + $0x8] sm:$0xff] %vm19_vm0, %v700_v23  ;;  %v645_v28 = vadd.f32 %v1094_v24, %v1030_v21  ;;  %v1032_v29 = vpop.f32.mrf.mxu0 }
  0xf2   :  { %v1033_v31 = vadd.f32 %v1032_v29, %v1031_v25  ;;  %v1096_v32 = vpop.f32.mrf.mxu1 }
  0xf3   :  { %v701_v33 = vadd.f32 %v645_v28, %v39_v26  ;;  %v1097_v34 = vadd.f32 %v1096_v32, %v1095_v27  ;;  %v1034_v35 = vpop.f32.mrf.mxu0  ;;  %v44_v27 = vld [vmem:[#allocation2 + $0x38] sm:$0xff] }
  0xf4   :  { %v735_v36 = vld [vmem:[#allocation2] sm:$0xff]  ;;  %v1098_v38 = vpop.f32.mrf.mxu1 }
  0xf5   :  { %v758_v39 = vadd.f32 %v1449_v30, %v735_v36  ;;  %718 = vst.msk [vmem:[#allocation2 + $0x10] sm:$0xff] %vm19_vm0, %v701_v33  ;;  %v648_v40 = vadd.f32 %v1097_v34, %v1033_v31  ;;  %v1035_v41 = vpop.f32.mrf.mxu0 }
  0xf6   :  { %v1036_v42 = vadd.f32 %v1035_v41, %v1034_v35  ;;  %v1099_v43 = vpop.f32.mrf.mxu1 }
  0xf7   :  { %vm774_vm1 = vcmp.ge.f32.partialorder %v758_v39, 0.0  ;;  %v790_v44 = vmul.f32 0.2, %v758_v39  ;;  %v702_v45 = vadd.f32 %v648_v40, %v40_v37  ;;  %v1100_v46 = vadd.f32 %v1099_v43, %v1098_v38  ;;  %v1037_v47 = vpop.f32.mrf.mxu0 }
  0xf8   :  { %v736_v48 = vld [vmem:[#allocation2 + $0x8] sm:$0xff]  ;;  %v1101_v50 = vpop.f32.mrf.mxu1 }
  0xf9   :  { %v806_v51 = vsel %vm774_vm1, %v758_v39, %v790_v44  ;;  %v759_v52 = vadd.f32 %v1449_v30, %v736_v48  ;;  %719 = vst.msk [vmem:[#allocation2 + $0x18] sm:$0xff] %vm19_vm0, %v702_v45  ;;  %v653_v53 = vadd.f32 %v1100_v46, %v1036_v42  ;;  %v1038_v54 = vpop.f32.mrf.mxu0  ;;  %v45_v42 = vld [vmem:[#allocation2 + $0x40] sm:$0xff] }
  0xfa   :  { %v990_v55 = vpack.c.bf16 %v806_v51, %v806_v51  ;;  %v1039_v56 = vadd.f32 %v1038_v54, %v1037_v47  ;;  %v1102_v57 = vpop.f32.mrf.mxu1 }
  0xfb   :  { %vm775_vm3 = vcmp.ge.f32.partialorder %v759_v52, 0.0  ;;  %v791_v58 = vmul.f32 0.2, %v759_v52  ;;  %v703_v59 = vadd.f32 %v653_v53, %v41_v49  ;;  %v1103_v60 = vadd.f32 %v1102_v57, %v1101_v50  ;;  %v1040_v61 = vpop.f32.mrf.mxu0 }
  0xfc   :  { %887 = vst.msk [vmem:[%s1548_s3] sm:$0xf] %vm886_vm2, %v990_v55  ;;  %v737_v62 = vld [vmem:[#allocation2 + $0x10] sm:$0xff]  ;;  %v1104_v0 = vpop.f32.mrf.mxu1 }
  0xfd   :  { %v807_v1 = vsel %vm775_vm3, %v759_v52, %v791_v58  ;;  %v760_v2 = vadd.f32 %v1449_v30, %v737_v62  ;;  %720 = vst.msk [vmem:[#allocation2 + $0x20] sm:$0xff] %vm19_vm0, %v703_v59  ;;  %v656_v3 = vadd.f32 %v1103_v60, %v1039_v56  ;;  %v1041_v4 = vpop.f32.mrf.mxu0  ;;  %v46_v56 = vld [vmem:[#allocation2 + $0x48] sm:$0xff] }
  0xfe   :  { %v991_v5 = vpack.c.bf16 %v807_v1, %v807_v1  ;;  %v1042_v6 = vadd.f32 %v1041_v4, %v1040_v61  ;;  %v1105_v7 = vpop.f32.mrf.mxu1 }
  0xff   :  { %vm776_vm4 = vcmp.ge.f32.partialorder %v760_v2, 0.0  ;;  %v792_v8 = vmul.f32 0.2, %v760_v2  ;;  %v704_v9 = vadd.f32 %v656_v3, %v42_v63  ;;  %v1106_v10 = vadd.f32 %v1105_v7, %v1104_v0  ;;  %v1043_v11 = vpop.f32.mrf.mxu0 }
 0x100   :  { %888 = vst.msk [vmem:[%s1548_s3 + $0x4] sm:$0xf] %vm886_vm2, %v991_v5  ;;  %v738_v12 = vld [vmem:[#allocation2 + $0x18] sm:$0xff]  ;;  %v1107_v14 = vpop.f32.mrf.mxu1 }
 0x101   :  { %v808_v15 = vsel %vm776_vm4, %v760_v2, %v792_v8  ;;  %v761_v16 = vadd.f32 %v1449_v30, %v738_v12  ;;  %721 = vst.msk [vmem:[#allocation2 + $0x28] sm:$0xff] %vm19_vm0, %v704_v9  ;;  %v661_v17 = vadd.f32 %v1106_v10, %v1042_v6  ;;  %v1044_v18 = vpop.f32.mrf.mxu0  ;;  %v47_v6 = vld [vmem:[#allocation2 + $0x50] sm:$0xff] }
 0x102   :  { %v992_v19 = vpack.c.bf16 %v808_v15, %v808_v15  ;;  %v1045_v20 = vadd.f32 %v1044_v18, %v1043_v11  ;;  %v1108_v21 = vpop.f32.mrf.mxu1 }
 0x103   :  { %vm777_vm5 = vcmp.ge.f32.partialorder %v761_v16, 0.0  ;;  %v793_v22 = vmul.f32 0.2, %v761_v16  ;;  %v705_v23 = vadd.f32 %v661_v17, %v43_v13  ;;  %v1109_v24 = vadd.f32 %v1108_v21, %v1107_v14  ;;  %v1046_v25 = vpop.f32.mrf.mxu0 }
 0x104   :  { %889 = vst.msk [vmem:[%s1548_s3 + $0x8] sm:$0xf] %vm886_vm2, %v992_v19  ;;  %v739_v26 = vld [vmem:[#allocation2 + $0x20] sm:$0xff]  ;;  %v1110_v28 = vpop.f32.mrf.mxu1 }
 0x105   :  { %v809_v29 = vsel %vm777_vm5, %v761_v16, %v793_v22  ;;  %v762_v31 = vadd.f32 %v1449_v30, %v739_v26  ;;  %722 = vst.msk [vmem:[#allocation2 + $0x30] sm:$0xff] %vm19_vm0, %v705_v23  ;;  %v664_v32 = vadd.f32 %v1109_v24, %v1045_v20  ;;  %v1047_v33 = vpop.f32.mrf.mxu0  ;;  %v48_v20 = vld [vmem:[#allocation2 + $0x58] sm:$0xff] }
 0x106   :  { %v993_v34 = vpack.c.bf16 %v809_v29, %v809_v29  ;;  %v1048_v35 = vadd.f32 %v1047_v33, %v1046_v25  ;;  %v1111_v36 = vpop.f32.mrf.mxu1 }
 0x107   :  { %vm778_vm6 = vcmp.ge.f32.partialorder %v762_v31, 0.0  ;;  %v794_v37 = vmul.f32 0.2, %v762_v31  ;;  %v706_v38 = vadd.f32 %v664_v32, %v44_v27  ;;  %v1112_v39 = vadd.f32 %v1111_v36, %v1110_v28  ;;  %v1049_v40 = vpop.f32.mrf.mxu0 }
 0x108   :  { %890 = vst.msk [vmem:[%s1548_s3 + $0xc] sm:$0xf] %vm886_vm2, %v993_v34  ;;  %v740_v41 = vld [vmem:[#allocation2 + $0x28] sm:$0xff]  ;;  %v1113_v43 = vpop.f32.mrf.mxu1 }
 0x109   :  { %v810_v44 = vsel %vm778_vm6, %v762_v31, %v794_v37  ;;  %v763_v45 = vadd.f32 %v1449_v30, %v740_v41  ;;  %723 = vst.msk [vmem:[#allocation2 + $0x38] sm:$0xff] %vm19_vm0, %v706_v38  ;;  %v669_v46 = vadd.f32 %v1112_v39, %v1048_v35  ;;  %v1050_v47 = vpop.f32.mrf.mxu0  ;;  %v49_v35 = vld [vmem:[#allocation2 + $0x60] sm:$0xff] }
 0x10a   :  { %v994_v48 = vpack.c.bf16 %v810_v44, %v810_v44  ;;  %v1051_v49 = vadd.f32 %v1050_v47, %v1049_v40  ;;  %v1114_v50 = vpop.f32.mrf.mxu1 }
 0x10b   :  { %vm779_vm7 = vcmp.ge.f32.partialorder %v763_v45, 0.0  ;;  %v795_v51 = vmul.f32 0.2, %v763_v45  ;;  %v707_v52 = vadd.f32 %v669_v46, %v45_v42  ;;  %v1115_v53 = vadd.f32 %v1114_v50, %v1113_v43  ;;  %v1052_v54 = vpop.f32.mrf.mxu0 }
 0x10c   :  { %891 = vst.msk [vmem:[%s1548_s3 + $0x10] sm:$0xf] %vm886_vm2, %v994_v48  ;;  %v741_v55 = vld [vmem:[#allocation2 + $0x30] sm:$0xff]  ;;  %v1116_v57 = vpop.f32.mrf.mxu1 }
 0x10d   :  { %v811_v58 = vsel %vm779_vm7, %v763_v45, %v795_v51  ;;  %v764_v59 = vadd.f32 %v1449_v30, %v741_v55  ;;  %724 = vst.msk [vmem:[#allocation2 + $0x40] sm:$0xff] %vm19_vm0, %v707_v52  ;;  %v672_v60 = vadd.f32 %v1115_v53, %v1051_v49  ;;  %v1053_v61 = vpop.f32.mrf.mxu0  ;;  %v50_v49 = vld [vmem:[#allocation2 + $0x68] sm:$0xff] }
 0x10e   :  { %v995_v62 = vpack.c.bf16 %v811_v58, %v811_v58  ;;  %v1054_v63 = vadd.f32 %v1053_v61, %v1052_v54  ;;  %v1117_v0 = vpop.f32.mrf.mxu1 }
 0x10f   :  { %vm780_vm8 = vcmp.ge.f32.partialorder %v764_v59, 0.0  ;;  %v796_v1 = vmul.f32 0.2, %v764_v59  ;;  %v708_v2 = vadd.f32 %v672_v60, %v46_v56  ;;  %v1118_v3 = vadd.f32 %v1117_v0, %v1116_v57  ;;  %v1055_v4 = vpop.f32.mrf.mxu0 }
 0x110   :  { %892 = vst.msk [vmem:[%s1548_s3 + $0x14] sm:$0xf] %vm886_vm2, %v995_v62  ;;  %v742_v5 = vld [vmem:[#allocation2 + $0x38] sm:$0xff]  ;;  %v1119_v7 = vpop.f32.mrf.mxu1 }
 0x111   :  { %v812_v8 = vsel %vm780_vm8, %v764_v59, %v796_v1  ;;  %v765_v9 = vadd.f32 %v1449_v30, %v742_v5  ;;  %725 = vst.msk [vmem:[#allocation2 + $0x48] sm:$0xff] %vm19_vm0, %v708_v2  ;;  %v677_v10 = vadd.f32 %v1118_v3, %v1054_v63  ;;  %v1056_v11 = vpop.f32.mrf.mxu0  ;;  %v51_v63 = vld [vmem:[#allocation2 + $0x70] sm:$0xff] }
 0x112   :  { %v996_v12 = vpack.c.bf16 %v812_v8, %v812_v8  ;;  %v1057_v13 = vadd.f32 %v1056_v11, %v1055_v4  ;;  %v1120_v14 = vpop.f32.mrf.mxu1 }
 0x113   :  { %vm781_vm9 = vcmp.ge.f32.partialorder %v765_v9, 0.0  ;;  %v797_v15 = vmul.f32 0.2, %v765_v9  ;;  %v709_v16 = vadd.f32 %v677_v10, %v47_v6  ;;  %v1121_v17 = vadd.f32 %v1120_v14, %v1119_v7  ;;  %v1058_v18 = vpop.f32.mrf.mxu0 }
 0x114   :  { %893 = vst.msk [vmem:[%s1548_s3 + $0x18] sm:$0xf] %vm886_vm2, %v996_v12  ;;  %v743_v19 = vld [vmem:[#allocation2 + $0x40] sm:$0xff]  ;;  %v1122_v21 = vpop.f32.mrf.mxu1  ;;  %v52_v12 = vld [vmem:[#allocation2 + $0x78] sm:$0xff] }
 0x115   :  { %v813_v22 = vsel %vm781_vm9, %v765_v9, %v797_v15  ;;  %v766_v23 = vadd.f32 %v1449_v30, %v743_v19  ;;  %726 = vst.msk [vmem:[#allocation2 + $0x50] sm:$0xff] %vm19_vm0, %v709_v16  ;;  %v680_v24 = vadd.f32 %v1121_v17, %v1057_v13  ;;  %v1059_v25 = vpop.f32.mrf.mxu0 }
 0x116   :  { %v997_v26 = vpack.c.bf16 %v813_v22, %v813_v22  ;;  %v1060_v27 = vadd.f32 %v1059_v25, %v1058_v18  ;;  %v1123_v28 = vpop.f32.mrf.mxu1 }
 0x117   :  { %vm782_vm10 = vcmp.ge.f32.partialorder %v766_v23, 0.0  ;;  %v798_v29 = vmul.f32 0.2, %v766_v23  ;;  %v710_v31 = vadd.f32 %v680_v24, %v48_v20  ;;  %v1124_v32 = vadd.f32 %v1123_v28, %v1122_v21  ;;  %v1061_v33 = vpop.f32.mrf.mxu0 }
 0x118   :  { %894 = vst.msk [vmem:[%s1548_s3 + $0x1c] sm:$0xf] %vm886_vm2, %v997_v26  ;;  %v744_v34 = vld [vmem:[#allocation2 + $0x48] sm:$0xff]  ;;  %v1125_v36 = vpop.f32.mrf.mxu1 }
 0x119   :  { %v814_v37 = vsel %vm782_vm10, %v766_v23, %v798_v29  ;;  %v767_v38 = vadd.f32 %v1449_v30, %v744_v34  ;;  %727 = vst.msk [vmem:[#allocation2 + $0x58] sm:$0xff] %vm19_vm0, %v710_v31  ;;  %v685_v39 = vadd.f32 %v1124_v32, %v1060_v27  ;;  %v1062_v40 = vpop.f32.mrf.mxu0 }
 0x11a   :  { %v998_v41 = vpack.c.bf16 %v814_v37, %v814_v37  ;;  %v1063_v42 = vadd.f32 %v1062_v40, %v1061_v33  ;;  %v1126_v43 = vpop.f32.mrf.mxu1 }
 0x11b   :  { %vm783_vm11 = vcmp.ge.f32.partialorder %v767_v38, 0.0  ;;  %v799_v44 = vmul.f32 0.2, %v767_v38  ;;  %v711_v45 = vadd.f32 %v685_v39, %v49_v35  ;;  %v1127_v46 = vadd.f32 %v1126_v43, %v1125_v36  ;;  %v1064_v47 = vpop.f32.mrf.mxu0 }
 0x11c   :  { %895 = vst.msk [vmem:[%s1548_s3 + $0x20] sm:$0xf] %vm886_vm2, %v998_v41  ;;  %v745_v48 = vld [vmem:[#allocation2 + $0x50] sm:$0xff]  ;;  %v1128_v50 = vpop.f32.mrf.mxu1 }
 0x11d   :  { %v815_v51 = vsel %vm783_vm11, %v767_v38, %v799_v44  ;;  %v768_v52 = vadd.f32 %v1449_v30, %v745_v48  ;;  %728 = vst.msk [vmem:[#allocation2 + $0x60] sm:$0xff] %vm19_vm0, %v711_v45  ;;  %v688_v53 = vadd.f32 %v1127_v46, %v1063_v42  ;;  %v1065_v54 = vpop.f32.mrf.mxu0 }
 0x11e   :  { %v999_v55 = vpack.c.bf16 %v815_v51, %v815_v51  ;;  %v1066_v56 = vadd.f32 %v1065_v54, %v1064_v47  ;;  %v1129_v57 = vpop.f32.mrf.mxu1 }
 0x11f   :  { %vm784_vm12 = vcmp.ge.f32.partialorder %v768_v52, 0.0  ;;  %v800_v58 = vmul.f32 0.2, %v768_v52  ;;  %v712_v59 = vadd.f32 %v688_v53, %v50_v49  ;;  %v1130_v60 = vadd.f32 %v1129_v57, %v1128_v50  ;;  %v1067_v61 = vpop.f32.mrf.mxu0 }
 0x120   :  { %896 = vst.msk [vmem:[%s1548_s3 + $0x24] sm:$0xf] %vm886_vm2, %v999_v55  ;;  %v746_v62 = vld [vmem:[#allocation2 + $0x58] sm:$0xff]  ;;  %v1131_v0 = vpop.f32.mrf.mxu1 }
 0x121   :  { %v816_v1 = vsel %vm784_vm12, %v768_v52, %v800_v58  ;;  %v769_v2 = vadd.f32 %v1449_v30, %v746_v62  ;;  %729 = vst.msk [vmem:[#allocation2 + $0x68] sm:$0xff] %vm19_vm0, %v712_v59  ;;  %v693_v3 = vadd.f32 %v1130_v60, %v1066_v56  ;;  %v1068_v4 = vpop.f32.mrf.mxu0 }
 0x122   :  { %v1000_v5 = vpack.c.bf16 %v816_v1, %v816_v1  ;;  %v1069_v6 = vadd.f32 %v1068_v4, %v1067_v61  ;;  %v1132_v7 = vpop.f32.mrf.mxu1 }
 0x123   :  { %vm785_vm13 = vcmp.ge.f32.partialorder %v769_v2, 0.0  ;;  %v801_v8 = vmul.f32 0.2, %v769_v2  ;;  %v713_v9 = vadd.f32 %v693_v3, %v51_v63  ;;  %v1133_v10 = vadd.f32 %v1132_v7, %v1131_v0 }
 0x124   :  { %897 = vst.msk [vmem:[%s1548_s3 + $0x28] sm:$0xf] %vm886_vm2, %v1000_v5  ;;  %v747_v11 = vld [vmem:[#allocation2 + $0x60] sm:$0xff] }
 0x125   :  { %v817_v13 = vsel %vm785_vm13, %v769_v2, %v801_v8  ;;  %v770_v14 = vadd.f32 %v1449_v30, %v747_v11  ;;  %730 = vst.msk [vmem:[#allocation2 + $0x70] sm:$0xff] %vm19_vm0, %v713_v9  ;;  %v696_v15 = vadd.f32 %v1133_v10, %v1069_v6 }
 0x126   :  { %v1001_v16 = vpack.c.bf16 %v817_v13, %v817_v13 }
 0x127   :  { %vm786_vm14 = vcmp.ge.f32.partialorder %v770_v14, 0.0  ;;  %v802_v17 = vmul.f32 0.2, %v770_v14  ;;  %v714_v18 = vadd.f32 %v696_v15, %v52_v12 }
 0x128   :  { %898 = vst.msk [vmem:[%s1548_s3 + $0x2c] sm:$0xf] %vm886_vm2, %v1001_v16  ;;  %v748_v19 = vld [vmem:[#allocation2 + $0x68] sm:$0xff] }
 0x129   :  { %v818_v20 = vsel %vm786_vm14, %v770_v14, %v802_v17  ;;  %v771_v21 = vadd.f32 %v1449_v30, %v748_v19  ;;  %731 = vst.msk [vmem:[#allocation2 + $0x78] sm:$0xff] %vm19_vm0, %v714_v18 }
 0x12a   :  { %v1002_v22 = vpack.c.bf16 %v818_v20, %v818_v20 }
 0x12b   :  { %vm787_vm15 = vcmp.ge.f32.partialorder %v771_v21, 0.0  ;;  %v803_v23 = vmul.f32 0.2, %v771_v21 }
 0x12c   :  { %899 = vst.msk [vmem:[%s1548_s3 + $0x30] sm:$0xf] %vm886_vm2, %v1002_v22  ;;  %v749_v24 = vld [vmem:[#allocation2 + $0x70] sm:$0xff] }
 0x12d   :  { %v819_v25 = vsel %vm787_vm15, %v771_v21, %v803_v23  ;;  %v772_v26 = vadd.f32 %v1449_v30, %v749_v24 }
 0x12e   :  { %v1003_v27 = vpack.c.bf16 %v819_v25, %v819_v25 }
 0x12f   :  { %vm788_vm1 = vcmp.ge.f32.partialorder %v772_v26, 0.0  ;;  %v804_v28 = vmul.f32 0.2, %v772_v26 }
 0x130   :  { %900 = vst.msk [vmem:[%s1548_s3 + $0x34] sm:$0xf] %vm886_vm2, %v1003_v27  ;;  %v750_v29 = vld [vmem:[#allocation2 + $0x78] sm:$0xff] }
 0x131   :  { %v820_v31 = vsel %vm788_vm1, %v772_v26, %v804_v28  ;;  %v773_v32 = vadd.f32 %v1449_v30, %v750_v29 }
 0x132   :  { %v1004_v33 = vpack.c.bf16 %v820_v31, %v820_v31 }
 0x133   :  { %vm789_vm0 = vcmp.ge.f32.partialorder %v773_v32, 0.0  ;;  %v805_v34 = vmul.f32 0.2, %v773_v32 }
 0x134   :  { %901 = vst.msk [vmem:[%s1548_s3 + $0x38] sm:$0xf] %vm886_vm2, %v1004_v33 }
 0x135   :  { %v821_v35 = vsel %vm789_vm0, %v773_v32, %v805_v34 }
 0x136   :  { %v1005_v36 = vpack.c.bf16 %v821_v35, %v821_v35 }
 0x138   :  { %902 = vst.msk [vmem:[%s1548_s3 + $0x3c] sm:$0xf] %vm886_vm2, %v1005_v36 }

// kernel: a_call__.7
= control target key start
LH: loop header
LB: loop body
LE: loop exit
PB: predicated region body
PF: predicated region fallthrough
CT: control target
= control target key end

     0   :  { %vm19_vm0 = vcmask 523264   ;;  %v651_v40 = vmov 0.0   ;;  %vm490_vm2 = vcmask 519168   ;;  %s819_s1 = inlined_call_operand.vmem [shape: bf16[512,64], index: 1, kind: input, shape index: {}]   ;;  %s820_s0 = inlined_call_operand.vmem [shape: bf16[32,512], index: 0, kind: input, shape index: {}]   ;;  %s821_s2 = inlined_call_operand.vmem [shape: f32[1,64], index: 2, kind: input, shape index: {}]   ;;  %s822_s3 = inlined_call_operand.vmem [shape: bf16[32,64], index: 3, kind: output, shape index: {}]  }
   0x1   :  { %v607_v0 = vld [vmem:[%s819_s1 + $0x78] sm:$0xff]   ;;  %v611_v4 = vld [vmem:[%s819_s1 + $0x70] sm:$0xff]   ;;  %v615_v8 = vld [vmem:[%s819_s1 + $0x68] sm:$0xff]   ;;  %20 = vst.msk [vmem:[#allocation2] sm:$0xff] %vm19_vm0, %v651_v40 }
   0x2   :  { %v608_v1 = vld [vmem:[%s819_s1 + $0xf8] sm:$0xff]   ;;  %550 = vmatprep.subr.bf16.mxu0 %v607_v0  ;;  %v612_v5 = vld [vmem:[%s819_s1 + $0xf0] sm:$0xff]   ;;  %v616_v9 = vld [vmem:[%s819_s1 + $0xe8] sm:$0xff]   ;;  %21 = vst.msk [vmem:[#allocation2 + $0x8] sm:$0xff] %vm19_vm0, %v651_v40 }
   0x3   :  { %v609_v2 = vld [vmem:[%s819_s1 + $0x38] sm:$0xff]   ;;  %578 = vmatprep.subr.bf16.mxu1 %v608_v1  ;;  %v613_v6 = vld [vmem:[%s819_s1 + $0x30] sm:$0xff]   ;;  %v617_v10 = vld [vmem:[%s819_s1 + $0x28] sm:$0xff]   ;;  %22 = vst.msk [vmem:[#allocation2 + $0x10] sm:$0xff] %vm19_vm0, %v651_v40 }
   0x4   :  { %v610_v3 = vld [vmem:[%s819_s1 + $0xb8] sm:$0xff]   ;;  %551 = vmatpush3.bf16.msra.mxu0 %v609_v2  ;;  %v614_v7 = vld [vmem:[%s819_s1 + $0xb0] sm:$0xff]   ;;  %v618_v11 = vld [vmem:[%s819_s1 + $0xa8] sm:$0xff]   ;;  %23 = vst.msk [vmem:[#allocation2 + $0x18] sm:$0xff] %vm19_vm0, %v651_v40 }
   0x5   :  { %579 = vmatpush3.bf16.msra.mxu1 %v610_v3  ;;  %552 = vmatprep.subr.bf16.mxu0 %v611_v4  ;;  %v619_v12 = vld [vmem:[%s819_s1 + $0x60] sm:$0xff]   ;;  %v623_v16 = vld [vmem:[%s819_s1 + $0x58] sm:$0xff]   ;;  %v627_v20 = vld [vmem:[%s819_s1 + $0x50] sm:$0xff]  }
   0x6   :  { %580 = vmatprep.subr.bf16.mxu1 %v612_v5  ;;  %v620_v13 = vld [vmem:[%s819_s1 + $0xe0] sm:$0xff]   ;;  %v624_v17 = vld [vmem:[%s819_s1 + $0xd8] sm:$0xff]   ;;  %v628_v21 = vld [vmem:[%s819_s1 + $0xd0] sm:$0xff]  }
   0x7   :  { %v621_v14 = vld [vmem:[%s819_s1 + $0x20] sm:$0xff]   ;;  %v625_v18 = vld [vmem:[%s819_s1 + $0x18] sm:$0xff]   ;;  %v629_v22 = vld [vmem:[%s819_s1 + $0x10] sm:$0xff]  }
   0x8   :  { %553 = vmatpush3.bf16.msra.mxu0 %v613_v6  ;;  %v622_v15 = vld [vmem:[%s819_s1 + $0xa0] sm:$0xff]   ;;  %v626_v19 = vld [vmem:[%s819_s1 + $0x98] sm:$0xff]   ;;  %v630_v23 = vld [vmem:[%s819_s1 + $0x90] sm:$0xff]  }
   0x9   :  { %581 = vmatpush3.bf16.msra.mxu1 %v614_v7  ;;  %554 = vmatprep.subr.bf16.mxu0 %v615_v8  ;;  %v631_v24 = vld [vmem:[%s819_s1 + $0x48] sm:$0xff]   ;;  %v635_v28 = vld [vmem:[%s819_s1 + $0x40] sm:$0xff]  }
   0xa   :  { %582 = vmatprep.subr.bf16.mxu1 %v616_v9  ;;  %v632_v25 = vld [vmem:[%s819_s1 + $0xc8] sm:$0xff]   ;;  %v636_v29 = vld [vmem:[%s819_s1 + $0xc0] sm:$0xff]   ;;  %v27_v2 = vld [vmem:[#allocation2 + $0x10] sm:$0xff] }
   0xb   :  { %v633_v26 = vld [vmem:[%s819_s1 + $0x8] sm:$0xff]   ;;  %v637_v30 = vld [vmem:[%s819_s1] sm:$0xff]  }
   0xc   :  { %555 = vmatpush3.bf16.msra.mxu0 %v617_v10  ;;  %v634_v27 = vld [vmem:[%s819_s1 + $0x88] sm:$0xff]   ;;  %v638_v31 = vld [vmem:[%s819_s1 + $0x80] sm:$0xff]  }
   0xd   :  { %583 = vmatpush3.bf16.msra.mxu1 %v618_v11  ;;  %556 = vmatprep.subr.bf16.mxu0 %v619_v12  ;;  %v639_v32 = vld [vmem:[%s820_s0] ss:$16 sps:$4 sm:$0xff]   ;;  %v641_v33 = vld [vmem:[%s820_s0 + $0x4] ss:$16 sps:$4 sm:$0xff]   ;;  %v642_v34 = vld [vmem:[%s820_s0 + $0x8] ss:$16 sps:$4 sm:$0xff]  }
   0xe   :  { %584 = vmatprep.subr.bf16.mxu1 %v620_v13  ;;  %v644_v35 = vld [vmem:[%s820_s0 + $0xc] ss:$16 sps:$4 sm:$0xff]   ;;  %369 = vmatprep.mubr.bf16.mxu0 %v641_v33  ;;  %v645_v36 = vld [vmem:[%s820_s0 + $0x24] ss:$16 sps:$4 sm:$0xff]   ;;  %v649_v38 = vld [vmem:[%s820_s0 + $0x20] ss:$16 sps:$4 sm:$0xff]  }
   0xf   :  { %418 = vmatprep.mubr.bf16.mxu1 %v644_v35  ;;  %v647_v37 = vld [vmem:[%s820_s0 + $0x2c] ss:$16 sps:$4 sm:$0xff]   ;;  %v650_v39 = vld [vmem:[%s820_s0 + $0x28] ss:$16 sps:$4 sm:$0xff]   ;;  %v25_v48 = vld [vmem:[#allocation2] sm:$0xff] }
  0x10   :  { %557 = vmatpush3.bf16.msra.mxu0 %v621_v14  ;;  %v26_v57 = vld [vmem:[#allocation2 + $0x8] sm:$0xff]  ;;  %v541_v6 = vld [vmem:[%s821_s2] ss:$0 sm:$0xff]  ;;  %v28_v12 = vld [vmem:[#allocation2 + $0x18] sm:$0xff] }
  0x11   :  { %585 = vmatpush3.bf16.msra.mxu1 %v622_v15  ;;  %558 = vmatprep.subr.bf16.mxu0 %v623_v16 }
  0x12   :  { %586 = vmatprep.subr.bf16.mxu1 %v624_v17 }
  0x14   :  { %559 = vmatpush3.bf16.msra.mxu0 %v625_v18 }
  0x15   :  { %587 = vmatpush3.bf16.msra.mxu1 %v626_v19  ;;  %560 = vmatprep.subr.bf16.mxu0 %v627_v20 }
  0x16   :  { %588 = vmatprep.subr.bf16.mxu1 %v628_v21 }
  0x18   :  { %561 = vmatpush3.bf16.msra.mxu0 %v629_v22 }
  0x19   :  { %589 = vmatpush3.bf16.msra.mxu1 %v630_v23  ;;  %562 = vmatprep.subr.bf16.mxu0 %v631_v24 }
  0x1a   :  { %590 = vmatprep.subr.bf16.mxu1 %v632_v25 }
  0x1c   :  { %563 = vmatpush3.bf16.msra.mxu0 %v633_v26 }
  0x1d   :  { %591 = vmatpush3.bf16.msra.mxu1 %v634_v27  ;;  %564 = vmatprep.subr.bf16.mxu0 %v635_v28 }
  0x1e   :  { %592 = vmatprep.subr.bf16.mxu1 %v636_v29 }
  0x20   :  { %565 = vmatpush3.bf16.msra.mxu0 %v637_v30 }
  0x21   :  { %593 = vmatpush3.bf16.msra.mxu1 %v638_v31 }
  0x23   :  { %370 = vmatmul.mubr.bf16.vlgmr.msra.gmra.mxu0 %v639_v32 }
  0x24   :  { %419 = vmatmul.mubr.bf16.vlgmr.msra.gmra.mxu1 %v642_v34  ;;  %377 = vmatprep.mubr.bf16.mxu0 %v645_v36 }
  0x25   :  { %426 = vmatprep.mubr.bf16.mxu1 %v647_v37 }
  0x2b   :  { %378 = vmatmul.mubr.bf16.gmra.mxu0 %v649_v38 }
  0x2c   :  { %427 = vmatmul.mubr.bf16.gmra.mxu1 %v650_v39 }
  0xe3   :  { %v566_v41 = vpop.f32.mrf.mxu0 }
  0xe4   :  { %v594_v42 = vpop.f32.mrf.mxu1 }
  0xe5   :  { %v567_v43 = vpop.f32.mrf.mxu0 }
  0xe6   :  { %v568_v44 = vadd.f32 %v567_v43, %v566_v41  ;;  %v595_v45 = vpop.f32.mrf.mxu1 }
  0xe7   :  { %v596_v46 = vadd.f32 %v595_v45, %v594_v42  ;;  %v569_v47 = vpop.f32.mrf.mxu0 }
  0xe8   :  { %v597_v49 = vpop.f32.mrf.mxu1 }
  0xe9   :  { %v421_v50 = vadd.f32 %v596_v46, %v568_v44  ;;  %v570_v51 = vpop.f32.mrf.mxu0 }
  0xea   :  { %v571_v52 = vadd.f32 %v570_v51, %v569_v47  ;;  %v598_v53 = vpop.f32.mrf.mxu1 }
  0xeb   :  { %v435_v54 = vadd.f32 %v421_v50, %v25_v48  ;;  %v599_v55 = vadd.f32 %v598_v53, %v597_v49  ;;  %v572_v56 = vpop.f32.mrf.mxu0 }
  0xec   :  { %v600_v58 = vpop.f32.mrf.mxu1 }
  0xed   :  { %440 = vst.msk [vmem:[#allocation2] sm:$0xff] %vm19_vm0, %v435_v54  ;;  %v424_v59 = vadd.f32 %v599_v55, %v571_v52  ;;  %v573_v60 = vpop.f32.mrf.mxu0 }
  0xee   :  { %v574_v61 = vadd.f32 %v573_v60, %v572_v56  ;;  %v601_v62 = vpop.f32.mrf.mxu1 }
  0xef   :  { %v436_v63 = vadd.f32 %v424_v59, %v26_v57  ;;  %v602_v0 = vadd.f32 %v601_v62, %v600_v58  ;;  %v575_v1 = vpop.f32.mrf.mxu0 }
  0xf0   :  { %v603_v3 = vpop.f32.mrf.mxu1 }
  0xf1   :  { %441 = vst.msk [vmem:[#allocation2 + $0x8] sm:$0xff] %vm19_vm0, %v436_v63  ;;  %v429_v4 = vadd.f32 %v602_v0, %v574_v61  ;;  %v576_v5 = vpop.f32.mrf.mxu0 }
  0xf2   :  { %v577_v7 = vadd.f32 %v576_v5, %v575_v1  ;;  %v604_v8 = vpop.f32.mrf.mxu1 }
  0xf3   :  { %v437_v9 = vadd.f32 %v429_v4, %v27_v2  ;;  %v605_v10 = vadd.f32 %v604_v8, %v603_v3 }
  0xf4   :  { %v447_v11 = vld [vmem:[#allocation2] sm:$0xff] }
  0xf5   :  { %v458_v13 = vadd.f32 %v541_v6, %v447_v11  ;;  %442 = vst.msk [vmem:[#allocation2 + $0x10] sm:$0xff] %vm19_vm0, %v437_v9  ;;  %v432_v14 = vadd.f32 %v605_v10, %v577_v7 }
  0xf7   :  { %vm462_vm1 = vcmp.ge.f32.partialorder %v458_v13, 0.0  ;;  %v466_v15 = vmul.f32 0.2, %v458_v13  ;;  %v438_v16 = vadd.f32 %v432_v14, %v28_v12 }
  0xf8   :  { %v448_v17 = vld [vmem:[#allocation2 + $0x8] sm:$0xff] }
  0xf9   :  { %v470_v18 = vsel %vm462_vm1, %v458_v13, %v466_v15  ;;  %v459_v19 = vadd.f32 %v541_v6, %v448_v17  ;;  %443 = vst.msk [vmem:[#allocation2 + $0x18] sm:$0xff] %vm19_vm0, %v438_v16 }
  0xfa   :  { %v546_v20 = vpack.c.bf16 %v470_v18, %v470_v18 }
  0xfb   :  { %vm463_vm3 = vcmp.ge.f32.partialorder %v459_v19, 0.0  ;;  %v467_v21 = vmul.f32 0.2, %v459_v19 }
  0xfc   :  { %491 = vst.msk [vmem:[%s822_s3] sm:$0xf] %vm490_vm2, %v546_v20  ;;  %v449_v22 = vld [vmem:[#allocation2 + $0x10] sm:$0xff] }
  0xfd   :  { %v471_v23 = vsel %vm463_vm3, %v459_v19, %v467_v21  ;;  %v460_v24 = vadd.f32 %v541_v6, %v449_v22 }
  0xfe   :  { %v547_v25 = vpack.c.bf16 %v471_v23, %v471_v23 }
  0xff   :  { %vm464_vm4 = vcmp.ge.f32.partialorder %v460_v24, 0.0  ;;  %v468_v26 = vmul.f32 0.2, %v460_v24 }
 0x100   :  { %492 = vst.msk [vmem:[%s822_s3 + $0x4] sm:$0xf] %vm490_vm2, %v547_v25  ;;  %v450_v27 = vld [vmem:[#allocation2 + $0x18] sm:$0xff] }
 0x101   :  { %v472_v28 = vsel %vm464_vm4, %v460_v24, %v468_v26  ;;  %v461_v29 = vadd.f32 %v541_v6, %v450_v27 }
 0x102   :  { %v548_v30 = vpack.c.bf16 %v472_v28, %v472_v28 }
 0x103   :  { %vm465_vm5 = vcmp.ge.f32.partialorder %v461_v29, 0.0  ;;  %v469_v31 = vmul.f32 0.2, %v461_v29 }
 0x104   :  { %493 = vst.msk [vmem:[%s822_s3 + $0x8] sm:$0xf] %vm490_vm2, %v548_v30 }
 0x105   :  { %v473_v32 = vsel %vm465_vm5, %v461_v29, %v469_v31 }
 0x106   :  { %v549_v33 = vpack.c.bf16 %v473_v32, %v473_v32 }
 0x108   :  { %494 = vst.msk [vmem:[%s822_s3 + $0xc] sm:$0xf] %vm490_vm2, %v549_v33 }

// kernel: a_call__.8
= control target key start
LH: loop header
LB: loop body
LE: loop exit
PB: predicated region body
PF: predicated region fallthrough
CT: control target
= control target key end

     0   :  { %s1144_s12 = smov 0   ;;  %s1146_s13 = smov 0   ;;  %s1264_s0 = inlined_call_operand.vmem [shape: bf16[32,1024], index: 0, kind: input, shape index: {}]   ;;  %s1265_s1 = inlined_call_operand.vmem [shape: bf16[1024,128], index: 1, kind: input, shape index: {}]   ;;  %s1266_s2 = inlined_call_operand.vmem [shape: f32[1,128], index: 2, kind: input, shape index: {}]   ;;  %s1267_s3 = inlined_call_operand.vmem [shape: bf16[32,128], index: 3, kind: output, shape index: {}]  }
   0x1   :  { %s1148_s14 = smov 0   ;;  %s1150_s15 = smov 0  }
   0x2   :  { %s1152_s16 = smov 0  }
   0x3 LB: > { %s25_s17 = sadd.s32 1, %s1117_s15  ;;  %p48_p1 = scmp.ne.s32.totalorder %s1109_s13, %s1105_s12  ;;  %s1121_s16 = sphi %s1152_s16, %s13_s16   ;;  %s1117_s15 = sphi %s1150_s15, %s1271_s15   ;;  %s1113_s14 = sphi %s1148_s14, %s1270_s14   ;;  %s1109_s13 = sphi %s1146_s13, %s1269_s13   ;;  %s1105_s12 = sphi %s1144_s12, %s1268_s12  }
   0x4   : > { %p26_p0 = scmp.ge.s32.totalorder %s25_s17, 2  ;;  %p49_p2 = scmp.eq.s32.totalorder %s1121_s16, 0 }
   0x5   : > { %s41_s19 = sadd.s32 1, %s1109_s13  ;;  %p867_p5 = scmp.ge.s32.totalorder %s1121_s16, 2 }
   0x6   : > { %s1273_s17 = smov (%p26_p0, %s25_s17), 0  ;;  %p50_p3 = por %p49_p2, %p48_p1 }
   0x7   : > { %s37_s18 = ssub.s32 %s1117_s15, %s1273_s17  ;;  %167 = sbr.rel (%p867_p5) target bundleno = 20 (0x14), region = 24 }
   0x8   : > { %p39_p4 = scmp.eq.s32.totalorder %s37_s18, 0 }
   0xa   : > { %s1179_s20 = scalar_select %p39_p4, %s1109_s13, %s41_s19  }
   0xc   : > { %170 = sbr.rel (!%p50_p3) target bundleno = 20 (0x14), region = 28  ;;  %s172_s21 = sand.u32 (%p50_p3), 1, %s1109_s13  }
   0xd   : > { %s926_s22 = sshll.u32 (%p50_p3), %s1117_s15, 4  ;;  %s868_s23 = sshll.u32 (%p50_p3), %s172_s21, 6 }
   0xe   : > { %s180_s26 = scalar_lea.vmem (%p50_p3), %s1264_s0, %s926_s22  ;;  %s174_s27 = scalar_lea.vmem (%p50_p3), [#allocation3], %s868_s23 }
   0xf   : > { %v193_v0 = vld [vmem:[%s180_s26] sm:$0xff] (%p50_p3)  ;;  %v195_v1 = vld [vmem:[%s180_s26 + $0x8] sm:$0xff] (%p50_p3) }
  0x10   : > { %v197_v2 = vld [vmem:[%s180_s26 + $0x20] sm:$0xff] (%p50_p3)  ;;  %194 = vst [vmem:[%s174_s27] sm:$0xff] (%p50_p3), %v193_v0  ;;  %196 = vst [vmem:[%s174_s27 + $0x8] sm:$0xff] (%p50_p3), %v195_v1  ;;  %v199_v3 = vld [vmem:[%s180_s26 + $0x28] sm:$0xff] (%p50_p3) }
  0x11   : > { %198 = vst [vmem:[%s174_s27 + $0x10] sm:$0xff] %v197_v2  ;;  %v201_v4 = vld [vmem:[%s180_s26 + $0x40] sm:$0xff]  ;;  %v203_v5 = vld [vmem:[%s180_s26 + $0x48] sm:$0xff]  ;;  %200 = vst [vmem:[%s174_s27 + $0x18] sm:$0xff] %v199_v3 }
  0x12   : > { %202 = vst [vmem:[%s174_s27 + $0x20] sm:$0xff] %v201_v4  ;;  %204 = vst [vmem:[%s174_s27 + $0x28] sm:$0xff] %v203_v5  ;;  %v205_v6 = vld [vmem:[%s180_s26 + $0x60] sm:$0xff]  ;;  %v207_v7 = vld [vmem:[%s180_s26 + $0x68] sm:$0xff] }
  0x13   : > { %206 = vst [vmem:[%s174_s27 + $0x30] sm:$0xff] %v205_v6  ;;  %208 = vst [vmem:[%s174_s27 + $0x38] sm:$0xff] %v207_v7 }
  0x14 PF: > { %p871_p6 = scmp.ge.s32.totalorder %s1121_s16, 1  ;;  %p213_p7 = scmp.lt.s32.totalorder %s1121_s16, 3 }
  0x16   : > { %p214_p8 = pnand %p871_p6, %p213_p7 }
  0x17   : > { %s220_s28 = sand.u32 (!%p214_p8), 1, %s1105_s12   ;;  %p873_p9 = scmp.ne.s32.totalorder (!%p214_p8), %s1113_s14, 0 }
  0x18   : > { %217 = sbr.rel (%p214_p8) target bundleno = 305 (0x131), region = 51  ;;  %s872_s29 = sshll.u32 (!%p214_p8), %s220_s28, 6 }
  0x19   : > { %s1190_s30 = scalar_lea.vmem (!%p214_p8), [#allocation3], %s872_s29 }
  0x1d   : > { %275 = sbr.rel (%p873_p9) target bundleno = 37 (0x25), region = 59 }
  0x22   : > { %v1123_v8 = vmov 0.0  }
  0x23   : > { %276 = vst [vmem:[#allocation2 + $0x10] sm:$0xff] %v1123_v8  ;;  %277 = vst [vmem:[#allocation2] sm:$0xff] %v1123_v8 }
  0x24   : > { %278 = vst [vmem:[#allocation2 + $0x18] sm:$0xff] %v1123_v8  ;;  %279 = vst [vmem:[#allocation2 + $0x8] sm:$0xff] %v1123_v8 }
  0x25 PF: > { %s874_s4 = sshll.u32 %s1113_s14, 9  ;;  %v1073_v9 = vld [vmem:[%s1190_s30 + $0x4] ss:$16 sps:$4 sm:$0xff]   ;;  %v1076_v10 = vld [vmem:[%s1190_s30 + $0xc] ss:$16 sps:$4 sm:$0xff]   ;;  %p916_p10 = scmp.ne.s32.totalorder %s1113_s14, 1 }
  0x26   : > { %s293_s5 = sshra.s32 %s874_s4, 3  ;;  %625 = vmatprep.mubr.bf16.mxu0 %v1073_v9  ;;  %674 = vmatprep.mubr.bf16.mxu1 %v1076_v10  ;;  %v1071_v41 = vld [vmem:[%s1190_s30] ss:$16 sps:$4 sm:$0xff]   ;;  %v1074_v44 = vld [vmem:[%s1190_s30 + $0x8] ss:$16 sps:$4 sm:$0xff]  }
  0x27   : > { %s875_s6 = sshll.u32 %s293_s5, 2  ;;  %v1077_v45 = vld [vmem:[%s1190_s30 + $0x24] ss:$16 sps:$4 sm:$0xff]   ;;  %v1079_v46 = vld [vmem:[%s1190_s30 + $0x2c] ss:$16 sps:$4 sm:$0xff]  }
  0x28   : > { %s1199_s9 = scalar_lea.vmem %s1265_s1, %s875_s6  ;;  %v1081_v47 = vld [vmem:[%s1190_s30 + $0x20] ss:$16 sps:$4 sm:$0xff]   ;;  %v1082_v48 = vld [vmem:[%s1190_s30 + $0x28] ss:$16 sps:$4 sm:$0xff]  }
  0x29   : > { %v1039_v11 = vld [vmem:[%s1199_s9 + $0x78] sm:$0xff]   ;;  %v1043_v15 = vld [vmem:[%s1199_s9 + $0x70] sm:$0xff]   ;;  %v1047_v19 = vld [vmem:[%s1199_s9 + $0x68] sm:$0xff]  }
  0x2a   : > { %v1040_v12 = vld [vmem:[%s1199_s9 + $0xf8] sm:$0xff]   ;;  %942 = vmatprep.subr.bf16.mxu0 %v1039_v11  ;;  %v1044_v16 = vld [vmem:[%s1199_s9 + $0xf0] sm:$0xff]   ;;  %v1048_v20 = vld [vmem:[%s1199_s9 + $0xe8] sm:$0xff]  }
  0x2b   : > { %v1041_v13 = vld [vmem:[%s1199_s9 + $0x38] sm:$0xff]   ;;  %970 = vmatprep.subr.bf16.mxu1 %v1040_v12  ;;  %v1045_v17 = vld [vmem:[%s1199_s9 + $0x30] sm:$0xff]   ;;  %v1049_v21 = vld [vmem:[%s1199_s9 + $0x28] sm:$0xff]  }
  0x2c   : > { %v1042_v14 = vld [vmem:[%s1199_s9 + $0xb8] sm:$0xff]   ;;  %943 = vmatpush3.bf16.msra.mxu0 %v1041_v13  ;;  %v1046_v18 = vld [vmem:[%s1199_s9 + $0xb0] sm:$0xff]   ;;  %v1050_v22 = vld [vmem:[%s1199_s9 + $0xa8] sm:$0xff]  }
  0x2d   : > { %971 = vmatpush3.bf16.msra.mxu1 %v1042_v14  ;;  %944 = vmatprep.subr.bf16.mxu0 %v1043_v15  ;;  %v1051_v23 = vld [vmem:[%s1199_s9 + $0x60] sm:$0xff]   ;;  %v1055_v27 = vld [vmem:[%s1199_s9 + $0x58] sm:$0xff]   ;;  %v1059_v31 = vld [vmem:[%s1199_s9 + $0x50] sm:$0xff]  }
  0x2e   : > { %972 = vmatprep.subr.bf16.mxu1 %v1044_v16  ;;  %v1052_v24 = vld [vmem:[%s1199_s9 + $0xe0] sm:$0xff]   ;;  %v1056_v28 = vld [vmem:[%s1199_s9 + $0xd8] sm:$0xff]   ;;  %v1060_v32 = vld [vmem:[%s1199_s9 + $0xd0] sm:$0xff]  }
  0x2f   : > { %v1053_v25 = vld [vmem:[%s1199_s9 + $0x20] sm:$0xff]   ;;  %v1057_v29 = vld [vmem:[%s1199_s9 + $0x18] sm:$0xff]   ;;  %v1061_v33 = vld [vmem:[%s1199_s9 + $0x10] sm:$0xff]  }
  0x30   : > { %945 = vmatpush3.bf16.msra.mxu0 %v1045_v17  ;;  %v1054_v26 = vld [vmem:[%s1199_s9 + $0xa0] sm:$0xff]   ;;  %v1058_v30 = vld [vmem:[%s1199_s9 + $0x98] sm:$0xff]   ;;  %v1062_v34 = vld [vmem:[%s1199_s9 + $0x90] sm:$0xff]  }
  0x31   : > { %973 = vmatpush3.bf16.msra.mxu1 %v1046_v18  ;;  %946 = vmatprep.subr.bf16.mxu0 %v1047_v19  ;;  %v1063_v35 = vld [vmem:[%s1199_s9 + $0x48] sm:$0xff]   ;;  %v1067_v39 = vld [vmem:[%s1199_s9 + $0x40] sm:$0xff]   ;;  %v281_v56 = vld [vmem:[#allocation2 + $0x10] sm:$0xff] }
  0x32   : > { %974 = vmatprep.subr.bf16.mxu1 %v1048_v20  ;;  %v1064_v36 = vld [vmem:[%s1199_s9 + $0xc8] sm:$0xff]   ;;  %v1068_v40 = vld [vmem:[%s1199_s9 + $0xc0] sm:$0xff]   ;;  %v283_v10 = vld [vmem:[#allocation2 + $0x18] sm:$0xff] }
  0x33   : > { %v1065_v37 = vld [vmem:[%s1199_s9 + $0x8] sm:$0xff]   ;;  %v1069_v42 = vld [vmem:[%s1199_s9] sm:$0xff]  }
  0x34   : > { %947 = vmatpush3.bf16.msra.mxu0 %v1049_v21  ;;  %v1066_v38 = vld [vmem:[%s1199_s9 + $0x88] sm:$0xff]   ;;  %v1070_v43 = vld [vmem:[%s1199_s9 + $0x80] sm:$0xff]  }
  0x35   : > { %975 = vmatpush3.bf16.msra.mxu1 %v1050_v22  ;;  %948 = vmatprep.subr.bf16.mxu0 %v1051_v23  ;;  %v282_v1 = vld [vmem:[#allocation2] sm:$0xff]  ;;  %v284_v18 = vld [vmem:[#allocation2 + $0x8] sm:$0xff] }
  0x36   : > { %976 = vmatprep.subr.bf16.mxu1 %v1052_v24 }
  0x38   : > { %949 = vmatpush3.bf16.msra.mxu0 %v1053_v25 }
  0x39   : > { %977 = vmatpush3.bf16.msra.mxu1 %v1054_v26  ;;  %950 = vmatprep.subr.bf16.mxu0 %v1055_v27 }
  0x3a   : > { %978 = vmatprep.subr.bf16.mxu1 %v1056_v28 }
  0x3c   : > { %951 = vmatpush3.bf16.msra.mxu0 %v1057_v29 }
  0x3d   : > { %979 = vmatpush3.bf16.msra.mxu1 %v1058_v30  ;;  %952 = vmatprep.subr.bf16.mxu0 %v1059_v31 }
  0x3e   : > { %980 = vmatprep.subr.bf16.mxu1 %v1060_v32 }
  0x40   : > { %953 = vmatpush3.bf16.msra.mxu0 %v1061_v33 }
  0x41   : > { %981 = vmatpush3.bf16.msra.mxu1 %v1062_v34  ;;  %954 = vmatprep.subr.bf16.mxu0 %v1063_v35 }
  0x42   : > { %982 = vmatprep.subr.bf16.mxu1 %v1064_v36 }
  0x44   : > { %955 = vmatpush3.bf16.msra.mxu0 %v1065_v37 }
  0x45   : > { %983 = vmatpush3.bf16.msra.mxu1 %v1066_v38  ;;  %956 = vmatprep.subr.bf16.mxu0 %v1067_v39 }
  0x46   : > { %984 = vmatprep.subr.bf16.mxu1 %v1068_v40 }
  0x48   : > { %957 = vmatpush3.bf16.msra.mxu0 %v1069_v42 }
  0x49   : > { %985 = vmatpush3.bf16.msra.mxu1 %v1070_v43 }
  0x4b   : > { %626 = vmatmul.mubr.bf16.vlgmr.msra.gmra.mxu0 %v1071_v41 }
  0x4c   : > { %675 = vmatmul.mubr.bf16.vlgmr.msra.gmra.mxu1 %v1074_v44  ;;  %633 = vmatprep.mubr.bf16.mxu0 %v1077_v45 }
  0x4d   : > { %682 = vmatprep.mubr.bf16.mxu1 %v1079_v46 }
  0x53   : > { %634 = vmatmul.mubr.bf16.gmra.mxu0 %v1081_v47 }
  0x54   : > { %683 = vmatmul.mubr.bf16.gmra.mxu1 %v1082_v48 }
 0x10b   : > { %v958_v49 = vpop.f32.mrf.mxu0 }
 0x10c   : > { %v986_v50 = vpop.f32.mrf.mxu1 }
 0x10d   : > { %v959_v51 = vpop.f32.mrf.mxu0 }
 0x10e   : > { %v960_v52 = vadd.f32 %v959_v51, %v958_v49  ;;  %v987_v53 = vpop.f32.mrf.mxu1 }
 0x10f   : > { %v988_v54 = vadd.f32 %v987_v53, %v986_v50  ;;  %v961_v55 = vpop.f32.mrf.mxu0 }
 0x110   : > { %v989_v57 = vpop.f32.mrf.mxu1 }
 0x111   : > { %v677_v58 = vadd.f32 %v988_v54, %v960_v52  ;;  %v962_v59 = vpop.f32.mrf.mxu0 }
 0x112   : > { %v963_v60 = vadd.f32 %v962_v59, %v961_v55  ;;  %v990_v61 = vpop.f32.mrf.mxu1 }
 0x113   : > { %v691_v62 = vadd.f32 %v677_v58, %v281_v56  ;;  %v991_v63 = vadd.f32 %v990_v61, %v989_v57  ;;  %v964_v0 = vpop.f32.mrf.mxu0 }
 0x114   : > { %v992_v2 = vpop.f32.mrf.mxu1 }
 0x115   : > { %695 = vst [vmem:[#allocation2 + $0x10] sm:$0xff] %v691_v62  ;;  %v680_v3 = vadd.f32 %v991_v63, %v963_v60  ;;  %v965_v4 = vpop.f32.mrf.mxu0 }
 0x116   : > { %v966_v5 = vadd.f32 %v965_v4, %v964_v0  ;;  %v993_v6 = vpop.f32.mrf.mxu1 }
 0x117   : > { %v692_v7 = vadd.f32 %v680_v3, %v282_v1  ;;  %v994_v8 = vadd.f32 %v993_v6, %v992_v2  ;;  %v967_v9 = vpop.f32.mrf.mxu0 }
 0x118   : > { %v995_v11 = vpop.f32.mrf.mxu1 }
 0x119   : > { %696 = vst [vmem:[#allocation2] sm:$0xff] %v692_v7  ;;  %v685_v12 = vadd.f32 %v994_v8, %v966_v5  ;;  %v968_v13 = vpop.f32.mrf.mxu0 }
 0x11a   : > { %v969_v14 = vadd.f32 %v968_v13, %v967_v9  ;;  %v996_v15 = vpop.f32.mrf.mxu1 }
 0x11b   : > { %v693_v16 = vadd.f32 %v685_v12, %v283_v10  ;;  %v997_v17 = vadd.f32 %v996_v15, %v995_v11 }
 0x11d   : > { %697 = vst [vmem:[#allocation2 + $0x18] sm:$0xff] %v693_v16  ;;  %v688_v19 = vadd.f32 %v997_v17, %v969_v14  ;;  %702 = sbr.rel (%p916_p10) target bundleno = 305 (0x131), region = 63 }
 0x11f   : > { %v694_v20 = vadd.f32 %v688_v19, %v284_v18 }
 0x121   : > { %698 = vst [vmem:[#allocation2 + $0x8] sm:$0xff] %v694_v20 }
 0x122   : > { %v703_v21 = vld [vmem:[#allocation2 + $0x10] sm:$0xff]  ;;  %v704_v22 = vld [vmem:[#allocation2] sm:$0xff] }
 0x123   : > { %v917_v23 = vld [vmem:[%s1266_s2] ss:$0 sm:$0xff] }
 0x124   : > { %v714_v24 = vadd.f32 %v917_v23, %v703_v21  ;;  %v715_v25 = vadd.f32 %v917_v23, %v704_v22  ;;  %v705_v26 = vld [vmem:[#allocation2 + $0x18] sm:$0xff] }
 0x125   : > { %v716_v28 = vadd.f32 %v917_v23, %v705_v26 }
 0x126   : > { %vm718_vm0 = vcmp.ge.f32.partialorder %v714_v24, 0.0  ;;  %vm719_vm1 = vcmp.ge.f32.partialorder %v715_v25, 0.0  ;;  %v722_v30 = vmul.f32 0.2, %v714_v24  ;;  %v723_v31 = vmul.f32 0.2, %v715_v25 }
 0x127   : > { %vm720_vm2 = vcmp.ge.f32.partialorder %v716_v28, 0.0  ;;  %v724_v32 = vmul.f32 0.2, %v716_v28 }
 0x128   : > { %v706_v27 = vld [vmem:[#allocation2 + $0x8] sm:$0xff]  ;;  %v726_v34 = vsel %vm718_vm0, %v714_v24, %v722_v30  ;;  %v727_v35 = vsel %vm719_vm1, %v715_v25, %v723_v31 }
 0x129   : > { %v717_v29 = vadd.f32 %v917_v23, %v706_v27  ;;  %v934_v36 = vpack.c.bf16 %v727_v35, %v726_v34  ;;  %v728_v37 = vsel %vm720_vm2, %v716_v28, %v724_v32 }
 0x12b   : > { %vm721_vm3 = vcmp.ge.f32.partialorder %v717_v29, 0.0  ;;  %v725_v33 = vmul.f32 0.2, %v717_v29  ;;  %935 = vst [vmem:[%s1267_s3] sm:$0xff] %v934_v36  }
 0x12d   : > { %v729_v38 = vsel %vm721_vm3, %v717_v29, %v725_v33 }
 0x12e   : > { %v939_v39 = vpack.c.bf16 %v729_v38, %v728_v37 }
 0x130   : > { %941 = vst [vmem:[%s1267_s3 + $0x8] sm:$0xff] %v939_v39  }
 0x131 PF: > { %s13_s16 = sadd.s32 1, %s1121_s16   ;;  %s1268_s12 = smov %s1109_s13 }
 0x132   : > { %p10_p11 = scmp.ge.s32.totalorder %s13_s16, 4   ;;  %s1269_s13 = smov %s1179_s20 }
 0x133   : > { %s1270_s14 = smov %s1117_s15  ;;  %s1271_s15 = smov %s1273_s17 }
 0x134   :  { %12 = sbr.rel (!%p10_p11) target bundleno = 3 (0x3), region = 105 }

// kernel: a_call__.9
= control target key start
LH: loop header
LB: loop body
LE: loop exit
PB: predicated region body
PF: predicated region fallthrough
CT: control target
= control target key end

     0   :  { %s1013_s12 = smov 0   ;;  %s1015_s13 = smov 0   ;;  %s1129_s0 = inlined_call_operand.vmem [shape: bf16[16,2048], index: 0, kind: input, shape index: {}]   ;;  %s1130_s1 = inlined_call_operand.vmem [shape: bf16[2048,128], index: 1, kind: input, shape index: {}]   ;;  %s1131_s2 = inlined_call_operand.vmem [shape: f32[1,128], index: 2, kind: input, shape index: {}]   ;;  %s1132_s3 = inlined_call_operand.vmem [shape: f32[16,128], index: 3, kind: output, shape index: {}]  }
   0x1   :  { %s1017_s14 = smov 0   ;;  %s1019_s15 = smov 0  }
   0x2   :  { %s1021_s16 = smov 0  }
   0x3 LB: > { %s25_s17 = sadd.s32 1, %s986_s15  ;;  %p48_p1 = scmp.ne.s32.totalorder %s978_s13, %s974_s12  ;;  %s990_s16 = sphi %s1021_s16, %s13_s16   ;;  %s986_s15 = sphi %s1019_s15, %s1136_s15   ;;  %s982_s14 = sphi %s1017_s14, %s1135_s14   ;;  %s978_s13 = sphi %s1015_s13, %s1134_s13   ;;  %s974_s12 = sphi %s1013_s12, %s1133_s12  }
   0x4   : > { %p26_p0 = scmp.ge.s32.totalorder %s25_s17, 4  ;;  %p49_p2 = scmp.eq.s32.totalorder %s990_s16, 0 }
   0x5   : > { %s41_s19 = sadd.s32 1, %s978_s13  ;;  %p777_p5 = scmp.ge.s32.totalorder %s990_s16, 4 }
   0x6   : > { %s1138_s17 = smov (%p26_p0, %s25_s17), 0  ;;  %p50_p3 = por %p49_p2, %p48_p1 }
   0x7   : > { %s37_s18 = ssub.s32 %s986_s15, %s1138_s17  ;;  %167 = sbr.rel (%p777_p5) target bundleno = 18 (0x12), region = 24 }
   0x8   : > { %p39_p4 = scmp.eq.s32.totalorder %s37_s18, 0 }
   0xa   : > { %s1048_s20 = scalar_select %p39_p4, %s978_s13, %s41_s19  }
   0xc   : > { %170 = sbr.rel (!%p50_p3) target bundleno = 18 (0x12), region = 28  ;;  %s172_s21 = sand.u32 (%p50_p3), 1, %s978_s13  }
   0xd   : > { %s828_s22 = sshll.u32 (%p50_p3), %s986_s15, 4  ;;  %s778_s23 = sshll.u32 (%p50_p3), %s172_s21, 5 }
   0xe   : > { %s180_s26 = scalar_lea.vmem (%p50_p3), %s1129_s0, %s828_s22  ;;  %s174_s27 = scalar_lea.vmem (%p50_p3), [#allocation3], %s778_s23 }
   0xf   : > { %v193_v0 = vld [vmem:[%s180_s26] sm:$0xff] (%p50_p3)  ;;  %v195_v1 = vld [vmem:[%s180_s26 + $0x8] sm:$0xff] (%p50_p3) }
  0x10   : > { %v197_v2 = vld [vmem:[%s180_s26 + $0x40] sm:$0xff] (%p50_p3)  ;;  %194 = vst [vmem:[%s174_s27] sm:$0xff] (%p50_p3), %v193_v0  ;;  %196 = vst [vmem:[%s174_s27 + $0x8] sm:$0xff] (%p50_p3), %v195_v1  ;;  %v199_v3 = vld [vmem:[%s180_s26 + $0x48] sm:$0xff] (%p50_p3) }
  0x11   : > { %198 = vst [vmem:[%s174_s27 + $0x10] sm:$0xff] %v197_v2  ;;  %200 = vst [vmem:[%s174_s27 + $0x18] sm:$0xff] %v199_v3 }
  0x12 PF: > { %p781_p6 = scmp.ge.s32.totalorder %s990_s16, 1  ;;  %p205_p7 = scmp.lt.s32.totalorder %s990_s16, 5 }
  0x14   : > { %p206_p8 = pnand %p781_p6, %p205_p7 }
  0x15   : > { %s212_s28 = sand.u32 (!%p206_p8), 1, %s974_s12   ;;  %p783_p9 = scmp.ne.s32.totalorder (!%p206_p8), %s982_s14, 0 }
  0x16   : > { %209 = sbr.rel (%p206_p8) target bundleno = 289 (0x121), region = 51  ;;  %s782_s29 = sshll.u32 (!%p206_p8), %s212_s28, 5 }
  0x17   : > { %s1059_s30 = scalar_lea.vmem (!%p206_p8), [#allocation3], %s782_s29 }
  0x1b   : > { %267 = sbr.rel (%p783_p9) target bundleno = 34 (0x22), region = 59 }
  0x20   : > { %v992_v4 = vmov 0.0  }
  0x21   : > { %268 = vst [vmem:[#allocation2] sm:$0xff] %v992_v4  ;;  %269 = vst [vmem:[#allocation2 + $0x8] sm:$0xff] %v992_v4 }
  0x22 PF: > { %s784_s4 = sshll.u32 %s982_s14, 9  ;;  %v948_v5 = vld [vmem:[%s1059_s30 + $0x4] ss:$16 sps:$4 sm:$0xff]   ;;  %v951_v6 = vld [vmem:[%s1059_s30 + $0xc] ss:$16 sps:$4 sm:$0xff]   ;;  %p822_p10 = scmp.ne.s32.totalorder %s982_s14, 3 }
  0x23   : > { %s277_s5 = sshra.s32 %s784_s4, 3  ;;  %589 = vmatprep.mubr.bf16.mxu0 %v948_v5  ;;  %630 = vmatprep.mubr.bf16.mxu1 %v951_v6  ;;  %v946_v37 = vld [vmem:[%s1059_s30] ss:$16 sps:$4 sm:$0xff]   ;;  %v949_v40 = vld [vmem:[%s1059_s30 + $0x8] ss:$16 sps:$4 sm:$0xff]  }
  0x24   : > { %s785_s6 = sshll.u32 %s277_s5, 2 }
  0x25   : > { %s1068_s9 = scalar_lea.vmem %s1130_s1, %s785_s6 }
  0x26   : > { %v914_v7 = vld [vmem:[%s1068_s9 + $0x78] sm:$0xff]   ;;  %v918_v11 = vld [vmem:[%s1068_s9 + $0x70] sm:$0xff]   ;;  %v922_v15 = vld [vmem:[%s1068_s9 + $0x68] sm:$0xff]  }
  0x27   : > { %v915_v8 = vld [vmem:[%s1068_s9 + $0xf8] sm:$0xff]   ;;  %829 = vmatprep.subr.bf16.mxu0 %v914_v7  ;;  %v919_v12 = vld [vmem:[%s1068_s9 + $0xf0] sm:$0xff]   ;;  %v923_v16 = vld [vmem:[%s1068_s9 + $0xe8] sm:$0xff]  }
  0x28   : > { %v916_v9 = vld [vmem:[%s1068_s9 + $0x38] sm:$0xff]   ;;  %851 = vmatprep.subr.bf16.mxu1 %v915_v8  ;;  %v920_v13 = vld [vmem:[%s1068_s9 + $0x30] sm:$0xff]   ;;  %v924_v17 = vld [vmem:[%s1068_s9 + $0x28] sm:$0xff]  }
  0x29   : > { %v917_v10 = vld [vmem:[%s1068_s9 + $0xb8] sm:$0xff]   ;;  %830 = vmatpush3.bf16.msra.mxu0 %v916_v9  ;;  %v921_v14 = vld [vmem:[%s1068_s9 + $0xb0] sm:$0xff]   ;;  %v925_v18 = vld [vmem:[%s1068_s9 + $0xa8] sm:$0xff]  }
  0x2a   : > { %852 = vmatpush3.bf16.msra.mxu1 %v917_v10  ;;  %831 = vmatprep.subr.bf16.mxu0 %v918_v11  ;;  %v926_v19 = vld [vmem:[%s1068_s9 + $0x60] sm:$0xff]   ;;  %v930_v23 = vld [vmem:[%s1068_s9 + $0x58] sm:$0xff]   ;;  %v934_v27 = vld [vmem:[%s1068_s9 + $0x50] sm:$0xff]  }
  0x2b   : > { %853 = vmatprep.subr.bf16.mxu1 %v919_v12  ;;  %v927_v20 = vld [vmem:[%s1068_s9 + $0xe0] sm:$0xff]   ;;  %v931_v24 = vld [vmem:[%s1068_s9 + $0xd8] sm:$0xff]   ;;  %v935_v28 = vld [vmem:[%s1068_s9 + $0xd0] sm:$0xff]  }
  0x2c   : > { %v928_v21 = vld [vmem:[%s1068_s9 + $0x20] sm:$0xff]   ;;  %v932_v25 = vld [vmem:[%s1068_s9 + $0x18] sm:$0xff]   ;;  %v936_v29 = vld [vmem:[%s1068_s9 + $0x10] sm:$0xff]  }
  0x2d   : > { %832 = vmatpush3.bf16.msra.mxu0 %v920_v13  ;;  %v929_v22 = vld [vmem:[%s1068_s9 + $0xa0] sm:$0xff]   ;;  %v933_v26 = vld [vmem:[%s1068_s9 + $0x98] sm:$0xff]   ;;  %v937_v30 = vld [vmem:[%s1068_s9 + $0x90] sm:$0xff]  }
  0x2e   : > { %854 = vmatpush3.bf16.msra.mxu1 %v921_v14  ;;  %833 = vmatprep.subr.bf16.mxu0 %v922_v15  ;;  %v938_v31 = vld [vmem:[%s1068_s9 + $0x48] sm:$0xff]   ;;  %v942_v35 = vld [vmem:[%s1068_s9 + $0x40] sm:$0xff]  }
  0x2f   : > { %855 = vmatprep.subr.bf16.mxu1 %v923_v16  ;;  %v939_v32 = vld [vmem:[%s1068_s9 + $0xc8] sm:$0xff]   ;;  %v943_v36 = vld [vmem:[%s1068_s9 + $0xc0] sm:$0xff]  }
  0x30   : > { %v940_v33 = vld [vmem:[%s1068_s9 + $0x8] sm:$0xff]   ;;  %v944_v38 = vld [vmem:[%s1068_s9] sm:$0xff]  }
  0x31   : > { %834 = vmatpush3.bf16.msra.mxu0 %v924_v17  ;;  %v941_v34 = vld [vmem:[%s1068_s9 + $0x88] sm:$0xff]   ;;  %v945_v39 = vld [vmem:[%s1068_s9 + $0x80] sm:$0xff]  }
  0x32   : > { %856 = vmatpush3.bf16.msra.mxu1 %v925_v18  ;;  %835 = vmatprep.subr.bf16.mxu0 %v926_v19  ;;  %v271_v48 = vld [vmem:[#allocation2] sm:$0xff]  ;;  %v272_v56 = vld [vmem:[#allocation2 + $0x8] sm:$0xff] }
  0x33   : > { %857 = vmatprep.subr.bf16.mxu1 %v927_v20 }
  0x35   : > { %836 = vmatpush3.bf16.msra.mxu0 %v928_v21 }
  0x36   : > { %858 = vmatpush3.bf16.msra.mxu1 %v929_v22  ;;  %837 = vmatprep.subr.bf16.mxu0 %v930_v23 }
  0x37   : > { %859 = vmatprep.subr.bf16.mxu1 %v931_v24 }
  0x39   : > { %838 = vmatpush3.bf16.msra.mxu0 %v932_v25 }
  0x3a   : > { %860 = vmatpush3.bf16.msra.mxu1 %v933_v26  ;;  %839 = vmatprep.subr.bf16.mxu0 %v934_v27 }
  0x3b   : > { %861 = vmatprep.subr.bf16.mxu1 %v935_v28 }
  0x3d   : > { %840 = vmatpush3.bf16.msra.mxu0 %v936_v29 }
  0x3e   : > { %862 = vmatpush3.bf16.msra.mxu1 %v937_v30  ;;  %841 = vmatprep.subr.bf16.mxu0 %v938_v31 }
  0x3f   : > { %863 = vmatprep.subr.bf16.mxu1 %v939_v32 }
  0x41   : > { %842 = vmatpush3.bf16.msra.mxu0 %v940_v33 }
  0x42   : > { %864 = vmatpush3.bf16.msra.mxu1 %v941_v34  ;;  %843 = vmatprep.subr.bf16.mxu0 %v942_v35 }
  0x43   : > { %865 = vmatprep.subr.bf16.mxu1 %v943_v36 }
  0x45   : > { %844 = vmatpush3.bf16.msra.mxu0 %v944_v38 }
  0x46   : > { %866 = vmatpush3.bf16.msra.mxu1 %v945_v39 }
  0x48   : > { %590 = vmatmul.mubr.bf16.vlgmr.msra.gmra.mxu0 %v946_v37 }
  0x49   : > { %631 = vmatmul.mubr.bf16.vlgmr.msra.gmra.mxu1 %v949_v40 }
 0x108   : > { %v845_v41 = vpop.f32.mrf.mxu0 }
 0x109   : > { %v867_v42 = vpop.f32.mrf.mxu1 }
 0x10a   : > { %v846_v43 = vpop.f32.mrf.mxu0 }
 0x10b   : > { %v847_v44 = vadd.f32 %v846_v43, %v845_v41  ;;  %v868_v45 = vpop.f32.mrf.mxu1 }
 0x10c   : > { %v869_v46 = vadd.f32 %v868_v45, %v867_v42  ;;  %v848_v47 = vpop.f32.mrf.mxu0 }
 0x10d   : > { %v870_v49 = vpop.f32.mrf.mxu1 }
 0x10e   : > { %v633_v50 = vadd.f32 %v869_v46, %v847_v44  ;;  %v849_v51 = vpop.f32.mrf.mxu0 }
 0x10f   : > { %v850_v52 = vadd.f32 %v849_v51, %v848_v47  ;;  %v871_v53 = vpop.f32.mrf.mxu1 }
 0x110   : > { %v639_v54 = vadd.f32 %v633_v50, %v271_v48  ;;  %v872_v55 = vadd.f32 %v871_v53, %v870_v49 }
 0x112   : > { %641 = vst [vmem:[#allocation2] sm:$0xff] %v639_v54  ;;  %v636_v57 = vadd.f32 %v872_v55, %v850_v52  ;;  %646 = sbr.rel (%p822_p10) target bundleno = 289 (0x121), region = 63 }
 0x114   : > { %v640_v58 = vadd.f32 %v636_v57, %v272_v56 }
 0x116   : > { %642 = vst [vmem:[#allocation2 + $0x8] sm:$0xff] %v640_v58 }
 0x117   : > { %v823_v60 = vld [vmem:[%s1131_s2] ss:$0 sm:$0xff] }
 0x119   : > { %v647_v59 = vld [vmem:[#allocation2] sm:$0xff] }
 0x11a   : > { %v656_v62 = vadd.f32 %v823_v60, %v647_v59 }
 0x11c   : > { %658 = vst [vmem:[%s1132_s3] sm:$0xff] %v656_v62 }
 0x11d   : > { %v648_v61 = vld [vmem:[#allocation2 + $0x8] sm:$0xff] }
 0x11e   : > { %v657_v63 = vadd.f32 %v823_v60, %v648_v61 }
 0x120   : > { %659 = vst [vmem:[%s1132_s3 + $0x8] sm:$0xff] %v657_v63 }
 0x121 PF: > { %s13_s16 = sadd.s32 1, %s990_s16   ;;  %s1133_s12 = smov %s978_s13 }
 0x122   : > { %p10_p11 = scmp.ge.s32.totalorder %s13_s16, 6   ;;  %s1134_s13 = smov %s1048_s20 }
 0x123   : > { %s1135_s14 = smov %s986_s15  ;;  %s1136_s15 = smov %s1138_s17 }
 0x124   :  { %12 = sbr.rel (!%p10_p11) target bundleno = 3 (0x3), region = 105 }

</bundles_post_ra>
